<compile_context>
chip_gen: v6e
topology: v6e:2x2x1
jax: 0.10.0
libtpu: 0.0.40
codegen_flags: <defaults>
</compile_context>

<pallas_src>
import functools
import math

import jax
import jax.numpy as jnp
from jax.experimental import pallas as pl
from jax.experimental.pallas import tpu as pltpu


# ---------------------------------------------------------------------------
# tiling / compiler-param helpers
# ---------------------------------------------------------------------------

_VMEM_LIMIT = 48 * 1024 * 1024   # fits v7x's 64 MiB physical VMEM with headroom; >> v5e's 16 MiB scoped default


def _cparams(*dimension_semantics):
    return pltpu.CompilerParams(dimension_semantics=dimension_semantics,
                                vmem_limit_bytes=_VMEM_LIMIT)


def _choose_tile(dim, target, align):
    """Largest multiple of `align` that divides `dim` and is <= target, else full dim.
    (Full-dim fallback is safe for BERT-style dims; huge prime dims would need padding.)"""
    if dim <= target:
        return dim
    t = (target // align) * align
    while t >= align:
        if dim % t == 0:
            return t
        t -= align
    return dim


def _row_tile(m, target):
    tm = _choose_tile(m, target, 8)
    # Prefer >= 2 row blocks so a 'parallel' grid axis can shard across both TCs (v7x megacore).
    if tm == m and m >= 16 and (m // 2) % 8 == 0:
        tm = m // 2
    return tm


# ---------------------------------------------------------------------------
# Pallas kernels
# ---------------------------------------------------------------------------

def _linear_kernel(x_ref, w_ref, b_ref, o_ref, *, act):
    # full-K dot: accumulation stays in the MXU result path (no VMEM f32 accumulator)
    y = jnp.dot(x_ref[...], w_ref[...], preferred_element_type=jnp.float32)
    y = y + b_ref[...].astype(jnp.float32)
    if act == "gelu":
        # TODO(synk): mptb uses exact erf-based GELU; tanh approximation kept for a guaranteed
        # Mosaic lowering (approx error ~1e-3, below bf16 activation precision).
        c = math.sqrt(2.0 / math.pi)
        y = 0.5 * y * (1.0 + jnp.tanh(c * (y + 0.044715 * (y * y * y))))
    o_ref[...] = y.astype(o_ref.dtype)


def linear(x, w, b, act="none", out_dtype=jnp.bfloat16,
           tm_target=512, tn_target=1024):
    """y = act(x @ w + b); w stored as (in, out) (PyTorch weight.T). bf16 in, f32 accumulate.
    2-D (rows, cols) grid, no K-tiling, both axes 'parallel'."""
    M, K = x.shape
    N = w.shape[1]
    tm = _row_tile(M, tm_target)
    tn = _choose_tile(N, tn_target, 128)          # full N whenever N <= 1024
    cost = pl.CostEstimate(
        flops=2 * M * N * K,
        transcendentals=M * N if act == "gelu" else 0,
        bytes_accessed=2 * (M * K + K * N + N + M * N),
    )
    return pl.pallas_call(
        functools.partial(_linear_kernel, act=act),
        out_shape=jax.ShapeDtypeStruct((M, N), out_dtype),
        grid=(M // tm, N // tn),
        in_specs=[
            pl.BlockSpec((tm, K), lambda i, j: (i, 0)),
            pl.BlockSpec((K, tn), lambda i, j: (0, j)),
            pl.BlockSpec((1, tn), lambda i, j: (0, j)),
        ],
        out_specs=pl.BlockSpec((tm, tn), lambda i, j: (i, j)),
        compiler_params=_cparams("parallel", "parallel"),
        cost_estimate=cost,
    )(x, w, b.reshape(1, N))


def _ln_core(x, g_ref, b_ref, eps):
    mu = jnp.mean(x, axis=-1, keepdims=True)
    xc = x - mu
    var = jnp.mean(xc * xc, axis=-1, keepdims=True)
    y = xc * jax.lax.rsqrt(var + eps)
    return y * g_ref[...].astype(jnp.float32) + b_ref[...].astype(jnp.float32)


def _linear_ln_kernel(x_ref, w_ref, b_ref, r_ref, g_ref, be_ref, o_ref, *, eps):
    # projection + bias + residual add + LayerNorm, all fused (one HBM write, zero re-reads)
    y = jnp.dot(x_ref[...], w_ref[...], preferred_element_type=jnp.float32)
    y = y + b_ref[...].astype(jnp.float32) + r_ref[...].astype(jnp.float32)
    o_ref[...] = _ln_core(y, g_ref, be_ref, eps).astype(o_ref.dtype)


def linear_bias_residual_layernorm(x, w, b, res, gamma, beta, eps=1e-12,
                                   out_dtype=jnp.bfloat16, tm_target=512):
    """LayerNorm(x @ w + b + res). Requires the full N (= hidden) per tile so LN row
    statistics stay in-register; dropout after the projection is identity (eval)."""
    M, K = x.shape
    N = w.shape[1]
    tm = _row_tile(M, tm_target)
    cost = pl.CostEstimate(
        flops=2 * M * N * K + 8 * M * N,
        transcendentals=M,
        bytes_accessed=2 * (M * K + K * N + 2 * M * N),
    )
    return pl.pallas_call(
        functools.partial(_linear_ln_kernel, eps=eps),
        out_shape=jax.ShapeDtypeStruct((M, N), out_dtype),
        grid=(M // tm,),
        in_specs=[
            pl.BlockSpec((tm, K), lambda i: (i, 0)),
            pl.BlockSpec((K, N), lambda i: (0, 0)),
            pl.BlockSpec((1, N), lambda i: (0, 0)),
            pl.BlockSpec((tm, N), lambda i: (i, 0)),
            pl.BlockSpec((1, N), lambda i: (0, 0)),
            pl.BlockSpec((1, N), lambda i: (0, 0)),
        ],
        out_specs=pl.BlockSpec((tm, N), lambda i: (i, 0)),
        compiler_params=_cparams("parallel"),
        cost_estimate=cost,
    )(x, w, b.reshape(1, N), res, gamma.reshape(1, N), beta.reshape(1, N))


def _layernorm_kernel(x_ref, g_ref, b_ref, o_ref, *, eps):
    x = x_ref[...].astype(jnp.float32)
    o_ref[...] = _ln_core(x, g_ref, b_ref, eps).astype(o_ref.dtype)


def layernorm(x, g, b, eps=1e-12, out_dtype=jnp.bfloat16, tm_target=512):
    M, H = x.shape
    tm = _row_tile(M, tm_target)
    return pl.pallas_call(
        functools.partial(_layernorm_kernel, eps=eps),
        out_shape=jax.ShapeDtypeStruct((M, H), out_dtype),
        grid=(M // tm,),
        in_specs=[
            pl.BlockSpec((tm, H), lambda i: (i, 0)),
            pl.BlockSpec((1, H), lambda i: (0, 0)),
            pl.BlockSpec((1, H), lambda i: (0, 0)),
        ],
        out_specs=pl.BlockSpec((tm, H), lambda i: (i, 0)),
        compiler_params=_cparams("parallel"),
    )(x, g.reshape(1, H), b.reshape(1, H))


def _attention_kernel(qkv_ref, m_ref, o_ref, *, num_heads):
    # qkv_ref: (S, 3*NH, D) bf16, heads ordered [q_0..q_{NH-1}, k_0.., v_0..]
    # m_ref:   (1, S) f32 additive key mask; o_ref: (S, NH, D)
    nh = num_heads
    bias = m_ref[...].astype(jnp.float32)
    for h in range(nh):   # static unroll; each head is plain 2-D MXU matmuls (no transposes)
        q = qkv_ref[:, h, :]                      # (S, D); 1/sqrt(D) pre-folded into W_q
        k = qkv_ref[:, nh + h, :]
        v = qkv_ref[:, 2 * nh + h, :]
        s = jax.lax.dot_general(q, k, (((1,), (1,)), ((), ())),
                                preferred_element_type=jnp.float32)    # (S, S) = q @ k.T
        s = s + bias                                                    # mask keys
        m = jnp.max(s, axis=-1, keepdims=True)
        p = jnp.exp((s - m).astype(jnp.bfloat16))   # bf16 exp: EUP bf16 path on v6e/v7x
        l = jnp.sum(p.astype(jnp.float32), axis=-1, keepdims=True)      # row-sum in f32
        ctx = jnp.dot(p, v, preferred_element_type=jnp.float32)         # (S, D), p bf16 for MXU
        ctx = ctx * pl.reciprocal(l, approx=True)   # deferred softmax normalization: O(S*D)
        o_ref[:, h, :] = ctx.astype(o_ref.dtype)


def attention(qkv, mask_bias, *, num_heads, out_dtype=jnp.bfloat16):
    """qkv: (B, S, 3*NH, D) bf16 (natural layout of the fused QKV projection output);
    mask_bias: (B, 1, S) f32 additive (-10000 for padding). Returns ctx (B, S, NH, D)."""
    # TODO(synk): for S >= 512 switch to a KV-tiled online-softmax (flash) form to avoid
    #             materializing the (S, S) score blocks (VMEM pressure, esp. v7x's 64 MiB).
    B, S, three_nh, D = qkv.shape
    return pl.pallas_call(
        functools.partial(_attention_kernel, num_heads=num_heads),
        out_shape=jax.ShapeDtypeStruct((B, S, num_heads, D), out_dtype),
        grid=(B,),
        in_specs=[
            pl.BlockSpec((None, S, three_nh, D), lambda b: (b, 0, 0, 0)),
            pl.BlockSpec((None, 1, S), lambda b: (b, 0, 0)),
        ],
        out_specs=pl.BlockSpec((None, S, num_heads, D), lambda b: (b, 0, 0, 0)),
        compiler_params=_cparams("parallel"),
    )(qkv, mask_bias)


def _head_kernel(x_ref, wp_ref, bp_ref, wr_ref, br_ref, o_ref):
    # BERT pooler: tanh(cls @ Wp + bp); dropout = identity (eval); regressor: relu(. @ Wr + br)
    pooled = jnp.tanh(
        jnp.dot(x_ref[...], wp_ref[...], preferred_element_type=jnp.float32)
        + bp_ref[...].astype(jnp.float32))
    y = (jnp.dot(pooled.astype(wr_ref.dtype), wr_ref[...],
                 preferred_element_type=jnp.float32)
         + br_ref[...].astype(jnp.float32))
    o_ref[...] = jnp.maximum(y, 0.0).astype(o_ref.dtype)


def regressor_head(cls_tok, wp, bp, wr, br, tb_target=256):
    B, H = cls_tok.shape
    O = wr.shape[1]
    tb = _choose_tile(B, tb_target, 8)
    return pl.pallas_call(
        _head_kernel,
        out_shape=jax.ShapeDtypeStruct((B, O), jnp.float32),
        grid=(B // tb,),
        in_specs=[
            pl.BlockSpec((tb, H), lambda i: (i, 0)),
            pl.BlockSpec((H, H), lambda i: (0, 0)),
            pl.BlockSpec((1, H), lambda i: (0, 0)),
            pl.BlockSpec((H, O), lambda i: (0, 0)),
            pl.BlockSpec((1, O), lambda i: (0, 0)),
        ],
        out_specs=pl.BlockSpec((tb, O), lambda i: (i, 0)),
        compiler_params=_cparams("parallel"),
    )(cls_tok, wp, bp.reshape(1, H), wr, br.reshape(1, O))


# ---------------------------------------------------------------------------
# Model wiring (plain-JAX glue around the Pallas kernels — reshapes only, no transposes)
# ---------------------------------------------------------------------------

def bert_layer(x, mask_bias, p, B, S, H, num_heads):
    D = H // num_heads

    # fused QKV projection: one pallas_call, one read of x; the (B*S, 3H) output reshapes
    # (for free) to (B, S, 3*NH, D), which the attention kernel indexes directly.
    qkv = linear(x, p["qkv_w"], p["qkv_b"])
    qkv = qkv.reshape(B, S, 3 * num_heads, D)

    ctx = attention(qkv, mask_bias, num_heads=num_heads)     # (B, S, NH, D)
    ctx = ctx.reshape(B * S, H)                               # free reshape

    # attention-output projection + dropout(identity) + residual + LayerNorm, fused
    x = linear_bias_residual_layernorm(ctx, p["ao_w"], p["ao_b"], x,
                                       p["ln1_g"], p["ln1_b"])
    inter = linear(x, p["i_w"], p["i_b"], act="gelu")
    # FFN-output projection + dropout(identity) + residual + LayerNorm, fused
    x = linear_bias_residual_layernorm(inter, p["o_w"], p["o_b"], x,
                                       p["ln2_g"], p["ln2_b"])
    return x


def regressor_forward(params, input_ids, input_mask, *, num_heads):
    B, S = input_ids.shape
    H = params["word_emb"].shape[1]

    # Embeddings (gather is plain-JAX glue); token_type ids are all zero.
    x = (params["word_emb"][input_ids]
         + params["pos_emb"][:S][None, :, :]
         + params["type_emb"][0][None, None, :]).astype(jnp.bfloat16)
    x = x.reshape(B * S, H)
    x = layernorm(x, params["emb_ln_g"], params["emb_ln_b"])   # + dropout (identity, eval)

    # extended attention mask: (1 - mask) * -10000, broadcast over heads & query rows
    mask_bias = ((1.0 - input_mask.astype(jnp.float32)) * -10000.0).reshape(B, 1, S)

    for lyr in params["layers"]:
        x = bert_layer(x, mask_bias, lyr, B, S, H, num_heads)

    cls_tok = x.reshape(B, S, H)[:, 0, :]
    # dropout(pooled_output) is identity in eval; relu(regressor(...)) fused in head kernel
    return regressor_head(cls_tok, params["pool_w"], params["pool_b"],
                          params["reg_w"], params["reg_b"])


# ---------------------------------------------------------------------------
# Deterministic parameter init (BERT-style N(0,0.02), zero bias, LN gamma=1/beta=0)
# Weights/embeddings in bf16, LayerNorm params in f32. 1/sqrt(D) folded into W_q.
# ---------------------------------------------------------------------------

def init_params(key, *, vocab, max_pos, type_vocab, hidden, inter, num_layers,
                num_heads, output_num):
    kit = iter(jax.random.split(key, 8 + num_layers * 8))

    def nrm32(shape):
        return jax.random.normal(next(kit), shape, dtype=jnp.float32) * 0.02

    def nrm(shape):
        return nrm32(shape).astype(jnp.bfloat16)

    zeros_bf = lambda s: jnp.zeros(s, jnp.bfloat16)
    q_scale = 1.0 / math.sqrt(hidden // num_heads)

    params = {
        "word_emb": nrm((vocab, hidden)),
        "pos_emb": nrm((max_pos, hidden)),
        "type_emb": nrm((type_vocab, hidden)),
        "emb_ln_g": jnp.ones((hidden,), jnp.float32),
        "emb_ln_b": jnp.zeros((hidden,), jnp.float32),
        "layers": [],
        "pool_w": nrm((hidden, hidden)), "pool_b": zeros_bf((hidden,)),
        "reg_w": nrm((hidden, output_num)), "reg_b": zeros_bf((output_num,)),
    }
    for _ in range(num_layers):
        # fold the attention 1/sqrt(D) scale into the Q projection (in f32, then cast)
        q_w = (nrm32((hidden, hidden)) * q_scale).astype(jnp.bfloat16)
        k_w = nrm((hidden, hidden))
        v_w = nrm((hidden, hidden))
        params["layers"].append({
            # Q/K/V fused into a single (H, 3H) projection; columns = [q | k | v] head-major
            "qkv_w": jnp.concatenate([q_w, k_w, v_w], axis=1),
            "qkv_b": zeros_bf((3 * hidden,)),
            "ao_w": nrm((hidden, hidden)), "ao_b": zeros_bf((hidden,)),
            "ln1_g": jnp.ones((hidden,), jnp.float32),
            "ln1_b": jnp.zeros((hidden,), jnp.float32),
            "i_w": nrm((hidden, inter)), "i_b": zeros_bf((inter,)),
            "o_w": nrm((inter, hidden)), "o_b": zeros_bf((hidden,)),
            "ln2_g": jnp.ones((hidden,), jnp.float32),
            "ln2_b": jnp.zeros((hidden,), jnp.float32),
        })
    return params


# ---------------------------------------------------------------------------

if __name__ == "__main__":
    B, S = 2, 8
    HIDDEN, HEADS, INTER, LAYERS = 32, 2, 128, 2
    VOCAB, MAX_POS, TYPE_VOCAB, OUTPUT_NUM = 100, 32, 2, 1

    key = jax.random.PRNGKey(0)
    pkey, ikey = jax.random.split(key)

    params = init_params(pkey, vocab=VOCAB, max_pos=MAX_POS, type_vocab=TYPE_VOCAB,
                         hidden=HIDDEN, inter=INTER, num_layers=LAYERS,
                         num_heads=HEADS, output_num=OUTPUT_NUM)

    input_ids = jax.random.randint(ikey, (B, S), 0, VOCAB, dtype=jnp.int32)
    input_mask = jnp.ones((B, S), jnp.int32).at[1, 6:].set(0)   # second example padded

    fwd = jax.jit(functools.partial(regressor_forward, num_heads=HEADS))
    out = fwd(params, input_ids, input_mask)
    jax.block_until_ready(out)

    assert out.shape == (B, OUTPUT_NUM) and out.dtype == jnp.float32
    assert bool(jnp.all(out >= 0.0))   # ReLU output
    print("KERNEL_OK")
</pallas_src>

<mosaic_0001>
module attributes {stable_mosaic.version = 11 : i64} {
  func.func @_linear_ln_kernel(%arg0: i32, %arg1: memref<8x32xbf16, #tpu.memory_space<vmem>>, %arg2: memref<32x32xbf16, #tpu.memory_space<vmem>>, %arg3: memref<1x32xbf16, #tpu.memory_space<vmem>>, %arg4: memref<8x32xbf16, #tpu.memory_space<vmem>>, %arg5: memref<1x32xf32, #tpu.memory_space<vmem>>, %arg6: memref<1x32xf32, #tpu.memory_space<vmem>>, %arg7: memref<8x32xbf16, #tpu.memory_space<vmem>>) attributes {dimension_semantics = [#tpu.dimension_semantics<parallel>], iteration_bounds = array<i64: 2>, scalar_prefetch = 0 : i64, scratch_operands = 0 : i64, tpu.core_type = #tpu.core_type<tc>, window_params = [{transform_indices = @transform_0, window_bounds = array<i64: 8, 32>}, {pipeline_mode = #tpu.pipeline_mode<synchronous>, transform_indices = @transform_1, window_bounds = array<i64: 32, 32>}, {pipeline_mode = #tpu.pipeline_mode<synchronous>, transform_indices = @transform_2, window_bounds = array<i64: 1, 32>}, {transform_indices = @transform_3, window_bounds = array<i64: 8, 32>}, {pipeline_mode = #tpu.pipeline_mode<synchronous>, transform_indices = @transform_4, window_bounds = array<i64: 1, 32>}, {pipeline_mode = #tpu.pipeline_mode<synchronous>, transform_indices = @transform_5, window_bounds = array<i64: 1, 32>}, {transform_indices = @transform_6, window_bounds = array<i64: 8, 32>}]} {
    %c0 = arith.constant 0 : index
    %c0_0 = arith.constant 0 : index
    %0 = vector.load %arg1[%c0, %c0_0] : memref<8x32xbf16, #tpu.memory_space<vmem>>, vector<8x32xbf16>
    %c0_1 = arith.constant 0 : index
    %c0_2 = arith.constant 0 : index
    %1 = vector.load %arg2[%c0_1, %c0_2] : memref<32x32xbf16, #tpu.memory_space<vmem>>, vector<32x32xbf16>
    %cst = arith.constant dense<0.000000e+00> : vector<8x32xf32>
    %2 = tpu.matmul %0, %1, %cst {dimension_numbers = #tpu.dot_dimension_numbers<[1], [0], [0], [1], [0, 0, 1, 1], [], []>} : vector<8x32xbf16>, vector<32x32xbf16>, vector<8x32xf32> -> vector<8x32xf32>
    %c0_3 = arith.constant 0 : index
    %c0_4 = arith.constant 0 : index
    %3 = vector.load %arg3[%c0_3, %c0_4] : memref<1x32xbf16, #tpu.memory_space<vmem>>, vector<1x32xbf16>
    %4 = arith.extf %3 : vector<1x32xbf16> to vector<1x32xf32>
    %5 = vector.broadcast %4 : vector<1x32xf32> to vector<8x32xf32>
    %6 = arith.addf %2, %5 : vector<8x32xf32>
    %c0_5 = arith.constant 0 : index
    %c0_6 = arith.constant 0 : index
    %7 = vector.load %arg4[%c0_5, %c0_6] : memref<8x32xbf16, #tpu.memory_space<vmem>>, vector<8x32xbf16>
    %8 = arith.extf %7 : vector<8x32xbf16> to vector<8x32xf32>
    %9 = arith.addf %6, %8 : vector<8x32xf32>
    %cst_7 = arith.constant dense<0.000000e+00> : vector<8xf32>
    %10 = vector.multi_reduction <add>, %9, %cst_7 [1] : vector<8x32xf32> to vector<8xf32>
    %11 = vector.shape_cast %10 : vector<8xf32> to vector<8x1xf32>
    %cst_8 = arith.constant 3.200000e+01 : f32
    %12 = vector.broadcast %cst_8 : f32 to vector<8x1xf32>
    %13 = arith.divf %11, %12 : vector<8x1xf32>
    %14 = vector.broadcast %13 : vector<8x1xf32> to vector<8x32xf32>
    %15 = arith.subf %9, %14 : vector<8x32xf32>
    %16 = arith.mulf %15, %15 : vector<8x32xf32>
    %cst_9 = arith.constant dense<0.000000e+00> : vector<8xf32>
    %17 = vector.multi_reduction <add>, %16, %cst_9 [1] : vector<8x32xf32> to vector<8xf32>
    %18 = vector.shape_cast %17 : vector<8xf32> to vector<8x1xf32>
    %cst_10 = arith.constant 3.200000e+01 : f32
    %19 = vector.broadcast %cst_10 : f32 to vector<8x1xf32>
    %20 = arith.divf %18, %19 : vector<8x1xf32>
    %cst_11 = arith.constant 9.99999996E-13 : f32
    %21 = vector.broadcast %cst_11 : f32 to vector<8x1xf32>
    %22 = arith.addf %20, %21 : vector<8x1xf32>
    %23 = math.rsqrt %22 : vector<8x1xf32>
    %24 = vector.broadcast %23 : vector<8x1xf32> to vector<8x32xf32>
    %25 = arith.mulf %15, %24 : vector<8x32xf32>
    %c0_12 = arith.constant 0 : index
    %c0_13 = arith.constant 0 : index
    %26 = vector.load %arg5[%c0_12, %c0_13] : memref<1x32xf32, #tpu.memory_space<vmem>>, vector<1x32xf32>
    %27 = vector.broadcast %26 : vector<1x32xf32> to vector<8x32xf32>
    %28 = arith.mulf %25, %27 : vector<8x32xf32>
    %c0_14 = arith.constant 0 : index
    %c0_15 = arith.constant 0 : index
    %29 = vector.load %arg6[%c0_14, %c0_15] : memref<1x32xf32, #tpu.memory_space<vmem>>, vector<1x32xf32>
    %30 = vector.broadcast %29 : vector<1x32xf32> to vector<8x32xf32>
    %31 = arith.addf %28, %30 : vector<8x32xf32>
    %32 = arith.truncf %31 : vector<8x32xf32> to vector<8x32xbf16>
    %c0_16 = arith.constant 0 : index
    %c0_17 = arith.constant 0 : index
    %33 = vector.load %arg7[%c0_16, %c0_17] : memref<8x32xbf16, #tpu.memory_space<vmem>>, vector<8x32xbf16>
    tpu.vector_store %arg7[%c0_16, %c0_17], %32 {strides = array<i32>} : memref<8x32xbf16, #tpu.memory_space<vmem>>, vector<8x32xbf16>,
    return
  }
  func.func @transform_0(%arg0: i32) -> (i32, i32) {
    %c0_i32 = arith.constant 0 : i32
    %c0_i32_0 = arith.constant 0 : i32
    return %arg0, %c0_i32 : i32, i32
  }
  func.func @transform_1(%arg0: i32) -> (i32, i32) {
    %c0_i32 = arith.constant 0 : i32
    %c0_i32_0 = arith.constant 0 : i32
    %c0_i32_1 = arith.constant 0 : i32
    return %c0_i32, %c0_i32_0 : i32, i32
  }
  func.func @transform_2(%arg0: i32) -> (i32, i32) {
    %c0_i32 = arith.constant 0 : i32
    %c0_i32_0 = arith.constant 0 : i32
    %c0_i32_1 = arith.constant 0 : i32
    return %c0_i32, %c0_i32_0 : i32, i32
  }
  func.func @transform_3(%arg0: i32) -> (i32, i32) {
    %c0_i32 = arith.constant 0 : i32
    %c0_i32_0 = arith.constant 0 : i32
    return %arg0, %c0_i32 : i32, i32
  }
  func.func @transform_4(%arg0: i32) -> (i32, i32) {
    %c0_i32 = arith.constant 0 : i32
    %c0_i32_0 = arith.constant 0 : i32
    %c0_i32_1 = arith.constant 0 : i32
    return %c0_i32, %c0_i32_0 : i32, i32
  }
  func.func @transform_5(%arg0: i32) -> (i32, i32) {
    %c0_i32 = arith.constant 0 : i32
    %c0_i32_0 = arith.constant 0 : i32
    %c0_i32_1 = arith.constant 0 : i32
    return %c0_i32, %c0_i32_0 : i32, i32
  }
  func.func @transform_6(%arg0: i32) -> (i32, i32) {
    %c0_i32 = arith.constant 0 : i32
    %c0_i32_0 = arith.constant 0 : i32
    return %arg0, %c0_i32 : i32, i32
  }
}

module attributes {stable_mosaic.version = 11 : i64} {
  func.func @_linear_kernel(%arg0: i32, %arg1: i32, %arg2: memref<8x32xbf16, #tpu.memory_space<vmem>>, %arg3: memref<32x96xbf16, #tpu.memory_space<vmem>>, %arg4: memref<1x96xbf16, #tpu.memory_space<vmem>>, %arg5: memref<8x96xbf16, #tpu.memory_space<vmem>>) attributes {dimension_semantics = [#tpu.dimension_semantics<parallel>, #tpu.dimension_semantics<parallel>], iteration_bounds = array<i64: 2, 1>, scalar_prefetch = 0 : i64, scratch_operands = 0 : i64, tpu.core_type = #tpu.core_type<tc>, window_params = [{transform_indices = @transform_0, window_bounds = array<i64: 8, 32>}, {transform_indices = @transform_1, window_bounds = array<i64: 32, 96>}, {transform_indices = @transform_2, window_bounds = array<i64: 1, 96>}, {transform_indices = @transform_3, window_bounds = array<i64: 8, 96>}]} {
    %c0 = arith.constant 0 : index
    %c0_0 = arith.constant 0 : index
    %0 = vector.load %arg2[%c0, %c0_0] : memref<8x32xbf16, #tpu.memory_space<vmem>>, vector<8x32xbf16>
    %c0_1 = arith.constant 0 : index
    %c0_2 = arith.constant 0 : index
    %1 = vector.load %arg3[%c0_1, %c0_2] : memref<32x96xbf16, #tpu.memory_space<vmem>>, vector<32x96xbf16>
    %cst = arith.constant dense<0.000000e+00> : vector<8x96xf32>
    %2 = tpu.matmul %0, %1, %cst {dimension_numbers = #tpu.dot_dimension_numbers<[1], [0], [0], [1], [0, 0, 1, 1], [], []>} : vector<8x32xbf16>, vector<32x96xbf16>, vector<8x96xf32> -> vector<8x96xf32>
    %c0_3 = arith.constant 0 : index
    %c0_4 = arith.constant 0 : index
    %3 = vector.load %arg4[%c0_3, %c0_4] : memref<1x96xbf16, #tpu.memory_space<vmem>>, vector<1x96xbf16>
    %4 = arith.extf %3 : vector<1x96xbf16> to vector<1x96xf32>
    %5 = vector.broadcast %4 : vector<1x96xf32> to vector<8x96xf32>
    %6 = arith.addf %2, %5 : vector<8x96xf32>
    %7 = arith.truncf %6 : vector<8x96xf32> to vector<8x96xbf16>
    %c0_5 = arith.constant 0 : index
    %c0_6 = arith.constant 0 : index
    %8 = vector.load %arg5[%c0_5, %c0_6] : memref<8x96xbf16, #tpu.memory_space<vmem>>, vector<8x96xbf16>
    tpu.vector_store %arg5[%c0_5, %c0_6], %7 {strides = array<i32>} : memref<8x96xbf16, #tpu.memory_space<vmem>>, vector<8x96xbf16>,
    return
  }
  func.func @transform_0(%arg0: i32, %arg1: i32) -> (i32, i32) {
    %c0_i32 = arith.constant 0 : i32
    %c0_i32_0 = arith.constant 0 : i32
    return %arg0, %c0_i32 : i32, i32
  }
  func.func @transform_1(%arg0: i32, %arg1: i32) -> (i32, i32) {
    %c0_i32 = arith.constant 0 : i32
    %c0_i32_0 = arith.constant 0 : i32
    return %c0_i32, %arg1 : i32, i32
  }
  func.func @transform_2(%arg0: i32, %arg1: i32) -> (i32, i32) {
    %c0_i32 = arith.constant 0 : i32
    %c0_i32_0 = arith.constant 0 : i32
    return %c0_i32, %arg1 : i32, i32
  }
  func.func @transform_3(%arg0: i32, %arg1: i32) -> (i32, i32) {
    %c0_i32 = arith.constant 0 : i32
    return %arg0, %arg1 : i32, i32
  }
}

module attributes {stable_mosaic.version = 11 : i64} {
  func.func @_layernorm_kernel(%arg0: i32, %arg1: memref<8x32xbf16, #tpu.memory_space<vmem>>, %arg2: memref<1x32xf32, #tpu.memory_space<vmem>>, %arg3: memref<1x32xf32, #tpu.memory_space<vmem>>, %arg4: memref<8x32xbf16, #tpu.memory_space<vmem>>) attributes {dimension_semantics = [#tpu.dimension_semantics<parallel>], iteration_bounds = array<i64: 2>, scalar_prefetch = 0 : i64, scratch_operands = 0 : i64, tpu.core_type = #tpu.core_type<tc>, window_params = [{transform_indices = @transform_0, window_bounds = array<i64: 8, 32>}, {pipeline_mode = #tpu.pipeline_mode<synchronous>, transform_indices = @transform_1, window_bounds = array<i64: 1, 32>}, {pipeline_mode = #tpu.pipeline_mode<synchronous>, transform_indices = @transform_2, window_bounds = array<i64: 1, 32>}, {transform_indices = @transform_3, window_bounds = array<i64: 8, 32>}]} {
    %c0 = arith.constant 0 : index
    %c0_0 = arith.constant 0 : index
    %0 = vector.load %arg1[%c0, %c0_0] : memref<8x32xbf16, #tpu.memory_space<vmem>>, vector<8x32xbf16>
    %1 = arith.extf %0 : vector<8x32xbf16> to vector<8x32xf32>
    %cst = arith.constant dense<0.000000e+00> : vector<8xf32>
    %2 = vector.multi_reduction <add>, %1, %cst [1] : vector<8x32xf32> to vector<8xf32>
    %3 = vector.shape_cast %2 : vector<8xf32> to vector<8x1xf32>
    %cst_1 = arith.constant 3.200000e+01 : f32
    %4 = vector.broadcast %cst_1 : f32 to vector<8x1xf32>
    %5 = arith.divf %3, %4 : vector<8x1xf32>
    %6 = vector.broadcast %5 : vector<8x1xf32> to vector<8x32xf32>
    %7 = arith.subf %1, %6 : vector<8x32xf32>
    %8 = arith.mulf %7, %7 : vector<8x32xf32>
    %cst_2 = arith.constant dense<0.000000e+00> : vector<8xf32>
    %9 = vector.multi_reduction <add>, %8, %cst_2 [1] : vector<8x32xf32> to vector<8xf32>
    %10 = vector.shape_cast %9 : vector<8xf32> to vector<8x1xf32>
    %cst_3 = arith.constant 3.200000e+01 : f32
    %11 = vector.broadcast %cst_3 : f32 to vector<8x1xf32>
    %12 = arith.divf %10, %11 : vector<8x1xf32>
    %cst_4 = arith.constant 9.99999996E-13 : f32
    %13 = vector.broadcast %cst_4 : f32 to vector<8x1xf32>
    %14 = arith.addf %12, %13 : vector<8x1xf32>
    %15 = math.rsqrt %14 : vector<8x1xf32>
    %16 = vector.broadcast %15 : vector<8x1xf32> to vector<8x32xf32>
    %17 = arith.mulf %7, %16 : vector<8x32xf32>
    %c0_5 = arith.constant 0 : index
    %c0_6 = arith.constant 0 : index
    %18 = vector.load %arg2[%c0_5, %c0_6] : memref<1x32xf32, #tpu.memory_space<vmem>>, vector<1x32xf32>
    %19 = vector.broadcast %18 : vector<1x32xf32> to vector<8x32xf32>
    %20 = arith.mulf %17, %19 : vector<8x32xf32>
    %c0_7 = arith.constant 0 : index
    %c0_8 = arith.constant 0 : index
    %21 = vector.load %arg3[%c0_7, %c0_8] : memref<1x32xf32, #tpu.memory_space<vmem>>, vector<1x32xf32>
    %22 = vector.broadcast %21 : vector<1x32xf32> to vector<8x32xf32>
    %23 = arith.addf %20, %22 : vector<8x32xf32>
    %24 = arith.truncf %23 : vector<8x32xf32> to vector<8x32xbf16>
    %c0_9 = arith.constant 0 : index
    %c0_10 = arith.constant 0 : index
    %25 = vector.load %arg4[%c0_9, %c0_10] : memref<8x32xbf16, #tpu.memory_space<vmem>>, vector<8x32xbf16>
    tpu.vector_store %arg4[%c0_9, %c0_10], %24 {strides = array<i32>} : memref<8x32xbf16, #tpu.memory_space<vmem>>, vector<8x32xbf16>,
    return
  }
  func.func @transform_0(%arg0: i32) -> (i32, i32) {
    %c0_i32 = arith.constant 0 : i32
    %c0_i32_0 = arith.constant 0 : i32
    return %arg0, %c0_i32 : i32, i32
  }
  func.func @transform_1(%arg0: i32) -> (i32, i32) {
    %c0_i32 = arith.constant 0 : i32
    %c0_i32_0 = arith.constant 0 : i32
    %c0_i32_1 = arith.constant 0 : i32
    return %c0_i32, %c0_i32_0 : i32, i32
  }
  func.func @transform_2(%arg0: i32) -> (i32, i32) {
    %c0_i32 = arith.constant 0 : i32
    %c0_i32_0 = arith.constant 0 : i32
    %c0_i32_1 = arith.constant 0 : i32
    return %c0_i32, %c0_i32_0 : i32, i32
  }
  func.func @transform_3(%arg0: i32) -> (i32, i32) {
    %c0_i32 = arith.constant 0 : i32
    %c0_i32_0 = arith.constant 0 : i32
    return %arg0, %c0_i32 : i32, i32
  }
}

module attributes {stable_mosaic.version = 11 : i64} {
  func.func @_attention_kernel(%arg0: i32, %arg1: memref<1x8x6x16xbf16, #tpu.memory_space<vmem>>, %arg2: memref<1x1x8xf32, #tpu.memory_space<vmem>>, %arg3: memref<1x8x2x16xbf16, #tpu.memory_space<vmem>>) attributes {dimension_semantics = [#tpu.dimension_semantics<parallel>], iteration_bounds = array<i64: 2>, scalar_prefetch = 0 : i64, scratch_operands = 0 : i64, tpu.core_type = #tpu.core_type<tc>, window_params = [{transform_indices = @transform_0, window_bounds = array<i64: 1, 8, 6, 16>}, {transform_indices = @transform_1, window_bounds = array<i64: 1, 1, 8>}, {transform_indices = @transform_2, window_bounds = array<i64: 1, 8, 2, 16>}]} {
    %c0 = arith.constant 0 : index
    %c0_0 = arith.constant 0 : index
    %c0_1 = arith.constant 0 : index
    %0 = vector.load %arg2[%c0, %c0_0, %c0_1] : memref<1x1x8xf32, #tpu.memory_space<vmem>>, vector<1x1x8xf32>
    %1 = vector.shape_cast %0 : vector<1x1x8xf32> to vector<1x8xf32>
    %c0_2 = arith.constant 0 : index
    %c0_3 = arith.constant 0 : index
    %c0_4 = arith.constant 0 : index
    %c0_5 = arith.constant 0 : index
    %2 = vector.load %arg1[%c0_2, %c0_3, %c0_4, %c0_5] : memref<1x8x6x16xbf16, #tpu.memory_space<vmem>>, vector<1x8x1x16xbf16>
    %3 = vector.shape_cast %2 : vector<1x8x1x16xbf16> to vector<8x16xbf16>
    %c0_6 = arith.constant 0 : index
    %c0_7 = arith.constant 0 : index
    %c2 = arith.constant 2 : index
    %c0_8 = arith.constant 0 : index
    %4 = vector.load %arg1[%c0_6, %c0_7, %c2, %c0_8] : memref<1x8x6x16xbf16, #tpu.memory_space<vmem>>, vector<1x8x1x16xbf16>
    %5 = vector.shape_cast %4 : vector<1x8x1x16xbf16> to vector<8x16xbf16>
    %c0_9 = arith.constant 0 : index
    %c0_10 = arith.constant 0 : index
    %c4 = arith.constant 4 : index
    %c0_11 = arith.constant 0 : index
    %6 = vector.load %arg1[%c0_9, %c0_10, %c4, %c0_11] : memref<1x8x6x16xbf16, #tpu.memory_space<vmem>>, vector<1x8x1x16xbf16>
    %7 = vector.shape_cast %6 : vector<1x8x1x16xbf16> to vector<8x16xbf16>
    %cst = arith.constant dense<0.000000e+00> : vector<8x8xf32>
    %8 = tpu.matmul %3, %5, %cst {dimension_numbers = #tpu.dot_dimension_numbers<[1], [1], [0], [0], [0, 0, 1, 0], [], []>} : vector<8x16xbf16>, vector<8x16xbf16>, vector<8x8xf32> -> vector<8x8xf32>
    %9 = vector.broadcast %1 : vector<1x8xf32> to vector<8x8xf32>
    %10 = arith.addf %8, %9 : vector<8x8xf32>
    %cst_12 = arith.constant dense<0xFF800000> : vector<8xf32>
    %11 = vector.multi_reduction <maximumf>, %10, %cst_12 [1] : vector<8x8xf32> to vector<8xf32>
    %12 = vector.shape_cast %11 : vector<8xf32> to vector<8x1xf32>
    %13 = vector.broadcast %12 : vector<8x1xf32> to vector<8x8xf32>
    %14 = arith.subf %10, %13 : vector<8x8xf32>
    %15 = arith.truncf %14 : vector<8x8xf32> to vector<8x8xbf16>
    %16 = math.exp %15 : vector<8x8xbf16>
    %17 = arith.extf %16 : vector<8x8xbf16> to vector<8x8xf32>
    %cst_13 = arith.constant dense<0.000000e+00> : vector<8xf32>
    %18 = vector.multi_reduction <add>, %17, %cst_13 [1] : vector<8x8xf32> to vector<8xf32>
    %19 = vector.shape_cast %18 : vector<8xf32> to vector<8x1xf32>
    %cst_14 = arith.constant dense<0.000000e+00> : vector<8x16xf32>
    %20 = tpu.matmul %16, %7, %cst_14 {dimension_numbers = #tpu.dot_dimension_numbers<[1], [0], [0], [1], [0, 0, 1, 1], [], []>} : vector<8x8xbf16>, vector<8x16xbf16>, vector<8x16xf32> -> vector<8x16xf32>
    %21 = tpu.reciprocal %19 {approx = true} : vector<8x1xf32> -> vector<8x1xf32>
    %22 = vector.broadcast %21 : vector<8x1xf32> to vector<8x16xf32>
    %23 = arith.mulf %20, %22 : vector<8x16xf32>
    %24 = arith.truncf %23 : vector<8x16xf32> to vector<8x16xbf16>
    %c0_15 = arith.constant 0 : index
    %c0_16 = arith.constant 0 : index
    %c0_17 = arith.constant 0 : index
    %c0_18 = arith.constant 0 : index
    %25 = vector.load %arg3[%c0_15, %c0_16, %c0_17, %c0_18] : memref<1x8x2x16xbf16, #tpu.memory_space<vmem>>, vector<1x8x1x16xbf16>
    %26 = vector.shape_cast %25 : vector<1x8x1x16xbf16> to vector<8x16xbf16>
    %27 = vector.shape_cast %24 : vector<8x16xbf16> to vector<1x8x1x16xbf16>
    tpu.vector_store %arg3[%c0_15, %c0_16, %c0_17, %c0_18], %27 {strides = array<i32>} : memref<1x8x2x16xbf16, #tpu.memory_space<vmem>>, vector<1x8x1x16xbf16>,
    %c0_19 = arith.constant 0 : index
    %c0_20 = arith.constant 0 : index
    %c1 = arith.constant 1 : index
    %c0_21 = arith.constant 0 : index
    %28 = vector.load %arg1[%c0_19, %c0_20, %c1, %c0_21] : memref<1x8x6x16xbf16, #tpu.memory_space<vmem>>, vector<1x8x1x16xbf16>
    %29 = vector.shape_cast %28 : vector<1x8x1x16xbf16> to vector<8x16xbf16>
    %c0_22 = arith.constant 0 : index
    %c0_23 = arith.constant 0 : index
    %c3 = arith.constant 3 : index
    %c0_24 = arith.constant 0 : index
    %30 = vector.load %arg1[%c0_22, %c0_23, %c3, %c0_24] : memref<1x8x6x16xbf16, #tpu.memory_space<vmem>>, vector<1x8x1x16xbf16>
    %31 = vector.shape_cast %30 : vector<1x8x1x16xbf16> to vector<8x16xbf16>
    %c0_25 = arith.constant 0 : index
    %c0_26 = arith.constant 0 : index
    %c5 = arith.constant 5 : index
    %c0_27 = arith.constant 0 : index
    %32 = vector.load %arg1[%c0_25, %c0_26, %c5, %c0_27] : memref<1x8x6x16xbf16, #tpu.memory_space<vmem>>, vector<1x8x1x16xbf16>
    %33 = vector.shape_cast %32 : vector<1x8x1x16xbf16> to vector<8x16xbf16>
    %cst_28 = arith.constant dense<0.000000e+00> : vector<8x8xf32>
    %34 = tpu.matmul %29, %31, %cst_28 {dimension_numbers = #tpu.dot_dimension_numbers<[1], [1], [0], [0], [0, 0, 1, 0], [], []>} : vector<8x16xbf16>, vector<8x16xbf16>, vector<8x8xf32> -> vector<8x8xf32>
    %35 = vector.broadcast %1 : vector<1x8xf32> to vector<8x8xf32>
    %36 = arith.addf %34, %35 : vector<8x8xf32>
    %cst_29 = arith.constant dense<0xFF800000> : vector<8xf32>
    %37 = vector.multi_reduction <maximumf>, %36, %cst_29 [1] : vector<8x8xf32> to vector<8xf32>
    %38 = vector.shape_cast %37 : vector<8xf32> to vector<8x1xf32>
    %39 = vector.broadcast %38 : vector<8x1xf32> to vector<8x8xf32>
    %40 = arith.subf %36, %39 : vector<8x8xf32>
    %41 = arith.truncf %40 : vector<8x8xf32> to vector<8x8xbf16>
    %42 = math.exp %41 : vector<8x8xbf16>
    %43 = arith.extf %42 : vector<8x8xbf16> to vector<8x8xf32>
    %cst_30 = arith.constant dense<0.000000e+00> : vector<8xf32>
    %44 = vector.multi_reduction <add>, %43, %cst_30 [1] : vector<8x8xf32> to vector<8xf32>
    %45 = vector.shape_cast %44 : vector<8xf32> to vector<8x1xf32>
    %cst_31 = arith.constant dense<0.000000e+00> : vector<8x16xf32>
    %46 = tpu.matmul %42, %33, %cst_31 {dimension_numbers = #tpu.dot_dimension_numbers<[1], [0], [0], [1], [0, 0, 1, 1], [], []>} : vector<8x8xbf16>, vector<8x16xbf16>, vector<8x16xf32> -> vector<8x16xf32>
    %47 = tpu.reciprocal %45 {approx = true} : vector<8x1xf32> -> vector<8x1xf32>
    %48 = vector.broadcast %47 : vector<8x1xf32> to vector<8x16xf32>
    %49 = arith.mulf %46, %48 : vector<8x16xf32>
    %50 = arith.truncf %49 : vector<8x16xf32> to vector<8x16xbf16>
    %c0_32 = arith.constant 0 : index
    %c0_33 = arith.constant 0 : index
    %c1_34 = arith.constant 1 : index
    %c0_35 = arith.constant 0 : index
    %51 = vector.load %arg3[%c0_32, %c0_33, %c1_34, %c0_35] : memref<1x8x2x16xbf16, #tpu.memory_space<vmem>>, vector<1x8x1x16xbf16>
    %52 = vector.shape_cast %51 : vector<1x8x1x16xbf16> to vector<8x16xbf16>
    %53 = vector.shape_cast %50 : vector<8x16xbf16> to vector<1x8x1x16xbf16>
    tpu.vector_store %arg3[%c0_32, %c0_33, %c1_34, %c0_35], %53 {strides = array<i32>} : memref<1x8x2x16xbf16, #tpu.memory_space<vmem>>, vector<1x8x1x16xbf16>,
    return
  }
  func.func @transform_0(%arg0: i32) -> (i32, i32, i32, i32) {
    %c0_i32 = arith.constant 0 : i32
    %c0_i32_0 = arith.constant 0 : i32
    %c0_i32_1 = arith.constant 0 : i32
    %c0_i32_2 = arith.constant 0 : i32
    return %arg0, %c0_i32, %c0_i32_0, %c0_i32_1 : i32, i32, i32, i32
  }
  func.func @transform_1(%arg0: i32) -> (i32, i32, i32) {
    %c0_i32 = arith.constant 0 : i32
    %c0_i32_0 = arith.constant 0 : i32
    %c0_i32_1 = arith.constant 0 : i32
    return %arg0, %c0_i32, %c0_i32_0 : i32, i32, i32
  }
  func.func @transform_2(%arg0: i32) -> (i32, i32, i32, i32) {
    %c0_i32 = arith.constant 0 : i32
    %c0_i32_0 = arith.constant 0 : i32
    %c0_i32_1 = arith.constant 0 : i32
    %c0_i32_2 = arith.constant 0 : i32
    return %arg0, %c0_i32, %c0_i32_0, %c0_i32_1 : i32, i32, i32, i32
  }
}

module attributes {stable_mosaic.version = 11 : i64} {
  func.func @_linear_ln_kernel(%arg0: i32, %arg1: memref<8x128xbf16, #tpu.memory_space<vmem>>, %arg2: memref<128x32xbf16, #tpu.memory_space<vmem>>, %arg3: memref<1x32xbf16, #tpu.memory_space<vmem>>, %arg4: memref<8x32xbf16, #tpu.memory_space<vmem>>, %arg5: memref<1x32xf32, #tpu.memory_space<vmem>>, %arg6: memref<1x32xf32, #tpu.memory_space<vmem>>, %arg7: memref<8x32xbf16, #tpu.memory_space<vmem>>) attributes {dimension_semantics = [#tpu.dimension_semantics<parallel>], iteration_bounds = array<i64: 2>, scalar_prefetch = 0 : i64, scratch_operands = 0 : i64, tpu.core_type = #tpu.core_type<tc>, window_params = [{transform_indices = @transform_0, window_bounds = array<i64: 8, 128>}, {pipeline_mode = #tpu.pipeline_mode<synchronous>, transform_indices = @transform_1, window_bounds = array<i64: 128, 32>}, {pipeline_mode = #tpu.pipeline_mode<synchronous>, transform_indices = @transform_2, window_bounds = array<i64: 1, 32>}, {transform_indices = @transform_3, window_bounds = array<i64: 8, 32>}, {pipeline_mode = #tpu.pipeline_mode<synchronous>, transform_indices = @transform_4, window_bounds = array<i64: 1, 32>}, {pipeline_mode = #tpu.pipeline_mode<synchronous>, transform_indices = @transform_5, window_bounds = array<i64: 1, 32>}, {transform_indices = @transform_6, window_bounds = array<i64: 8, 32>}]} {
    %c0 = arith.constant 0 : index
    %c0_0 = arith.constant 0 : index
    %0 = vector.load %arg1[%c0, %c0_0] : memref<8x128xbf16, #tpu.memory_space<vmem>>, vector<8x128xbf16>
    %c0_1 = arith.constant 0 : index
    %c0_2 = arith.constant 0 : index
    %1 = vector.load %arg2[%c0_1, %c0_2] : memref<128x32xbf16, #tpu.memory_space<vmem>>, vector<128x32xbf16>
    %cst = arith.constant dense<0.000000e+00> : vector<8x32xf32>
    %2 = tpu.matmul %0, %1, %cst {dimension_numbers = #tpu.dot_dimension_numbers<[1], [0], [0], [1], [0, 0, 1, 1], [], []>} : vector<8x128xbf16>, vector<128x32xbf16>, vector<8x32xf32> -> vector<8x32xf32>
    %c0_3 = arith.constant 0 : index
    %c0_4 = arith.constant 0 : index
    %3 = vector.load %arg3[%c0_3, %c0_4] : memref<1x32xbf16, #tpu.memory_space<vmem>>, vector<1x32xbf16>
    %4 = arith.extf %3 : vector<1x32xbf16> to vector<1x32xf32>
    %5 = vector.broadcast %4 : vector<1x32xf32> to vector<8x32xf32>
    %6 = arith.addf %2, %5 : vector<8x32xf32>
    %c0_5 = arith.constant 0 : index
    %c0_6 = arith.constant 0 : index
    %7 = vector.load %arg4[%c0_5, %c0_6] : memref<8x32xbf16, #tpu.memory_space<vmem>>, vector<8x32xbf16>
    %8 = arith.extf %7 : vector<8x32xbf16> to vector<8x32xf32>
    %9 = arith.addf %6, %8 : vector<8x32xf32>
    %cst_7 = arith.constant dense<0.000000e+00> : vector<8xf32>
    %10 = vector.multi_reduction <add>, %9, %cst_7 [1] : vector<8x32xf32> to vector<8xf32>
    %11 = vector.shape_cast %10 : vector<8xf32> to vector<8x1xf32>
    %cst_8 = arith.constant 3.200000e+01 : f32
    %12 = vector.broadcast %cst_8 : f32 to vector<8x1xf32>
    %13 = arith.divf %11, %12 : vector<8x1xf32>
    %14 = vector.broadcast %13 : vector<8x1xf32> to vector<8x32xf32>
    %15 = arith.subf %9, %14 : vector<8x32xf32>
    %16 = arith.mulf %15, %15 : vector<8x32xf32>
    %cst_9 = arith.constant dense<0.000000e+00> : vector<8xf32>
    %17 = vector.multi_reduction <add>, %16, %cst_9 [1] : vector<8x32xf32> to vector<8xf32>
    %18 = vector.shape_cast %17 : vector<8xf32> to vector<8x1xf32>
    %cst_10 = arith.constant 3.200000e+01 : f32
    %19 = vector.broadcast %cst_10 : f32 to vector<8x1xf32>
    %20 = arith.divf %18, %19 : vector<8x1xf32>
    %cst_11 = arith.constant 9.99999996E-13 : f32
    %21 = vector.broadcast %cst_11 : f32 to vector<8x1xf32>
    %22 = arith.addf %20, %21 : vector<8x1xf32>
    %23 = math.rsqrt %22 : vector<8x1xf32>
    %24 = vector.broadcast %23 : vector<8x1xf32> to vector<8x32xf32>
    %25 = arith.mulf %15, %24 : vector<8x32xf32>
    %c0_12 = arith.constant 0 : index
    %c0_13 = arith.constant 0 : index
    %26 = vector.load %arg5[%c0_12, %c0_13] : memref<1x32xf32, #tpu.memory_space<vmem>>, vector<1x32xf32>
    %27 = vector.broadcast %26 : vector<1x32xf32> to vector<8x32xf32>
    %28 = arith.mulf %25, %27 : vector<8x32xf32>
    %c0_14 = arith.constant 0 : index
    %c0_15 = arith.constant 0 : index
    %29 = vector.load %arg6[%c0_14, %c0_15] : memref<1x32xf32, #tpu.memory_space<vmem>>, vector<1x32xf32>
    %30 = vector.broadcast %29 : vector<1x32xf32> to vector<8x32xf32>
    %31 = arith.addf %28, %30 : vector<8x32xf32>
    %32 = arith.truncf %31 : vector<8x32xf32> to vector<8x32xbf16>
    %c0_16 = arith.constant 0 : index
    %c0_17 = arith.constant 0 : index
    %33 = vector.load %arg7[%c0_16, %c0_17] : memref<8x32xbf16, #tpu.memory_space<vmem>>, vector<8x32xbf16>
    tpu.vector_store %arg7[%c0_16, %c0_17], %32 {strides = array<i32>} : memref<8x32xbf16, #tpu.memory_space<vmem>>, vector<8x32xbf16>,
    return
  }
  func.func @transform_0(%arg0: i32) -> (i32, i32) {
    %c0_i32 = arith.constant 0 : i32
    %c0_i32_0 = arith.constant 0 : i32
    return %arg0, %c0_i32 : i32, i32
  }
  func.func @transform_1(%arg0: i32) -> (i32, i32) {
    %c0_i32 = arith.constant 0 : i32
    %c0_i32_0 = arith.constant 0 : i32
    %c0_i32_1 = arith.constant 0 : i32
    return %c0_i32, %c0_i32_0 : i32, i32
  }
  func.func @transform_2(%arg0: i32) -> (i32, i32) {
    %c0_i32 = arith.constant 0 : i32
    %c0_i32_0 = arith.constant 0 : i32
    %c0_i32_1 = arith.constant 0 : i32
    return %c0_i32, %c0_i32_0 : i32, i32
  }
  func.func @transform_3(%arg0: i32) -> (i32, i32) {
    %c0_i32 = arith.constant 0 : i32
    %c0_i32_0 = arith.constant 0 : i32
    return %arg0, %c0_i32 : i32, i32
  }
  func.func @transform_4(%arg0: i32) -> (i32, i32) {
    %c0_i32 = arith.constant 0 : i32
    %c0_i32_0 = arith.constant 0 : i32
    %c0_i32_1 = arith.constant 0 : i32
    return %c0_i32, %c0_i32_0 : i32, i32
  }
  func.func @transform_5(%arg0: i32) -> (i32, i32) {
    %c0_i32 = arith.constant 0 : i32
    %c0_i32_0 = arith.constant 0 : i32
    %c0_i32_1 = arith.constant 0 : i32
    return %c0_i32, %c0_i32_0 : i32, i32
  }
  func.func @transform_6(%arg0: i32) -> (i32, i32) {
    %c0_i32 = arith.constant 0 : i32
    %c0_i32_0 = arith.constant 0 : i32
    return %arg0, %c0_i32 : i32, i32
  }
}

module attributes {stable_mosaic.version = 11 : i64} {
  func.func @_linear_kernel(%arg0: i32, %arg1: i32, %arg2: memref<8x32xbf16, #tpu.memory_space<vmem>>, %arg3: memref<32x128xbf16, #tpu.memory_space<vmem>>, %arg4: memref<1x128xbf16, #tpu.memory_space<vmem>>, %arg5: memref<8x128xbf16, #tpu.memory_space<vmem>>) attributes {dimension_semantics = [#tpu.dimension_semantics<parallel>, #tpu.dimension_semantics<parallel>], iteration_bounds = array<i64: 2, 1>, scalar_prefetch = 0 : i64, scratch_operands = 0 : i64, tpu.core_type = #tpu.core_type<tc>, window_params = [{transform_indices = @transform_0, window_bounds = array<i64: 8, 32>}, {transform_indices = @transform_1, window_bounds = array<i64: 32, 128>}, {transform_indices = @transform_2, window_bounds = array<i64: 1, 128>}, {transform_indices = @transform_3, window_bounds = array<i64: 8, 128>}]} {
    %c0 = arith.constant 0 : index
    %c0_0 = arith.constant 0 : index
    %0 = vector.load %arg2[%c0, %c0_0] : memref<8x32xbf16, #tpu.memory_space<vmem>>, vector<8x32xbf16>
    %c0_1 = arith.constant 0 : index
    %c0_2 = arith.constant 0 : index
    %1 = vector.load %arg3[%c0_1, %c0_2] : memref<32x128xbf16, #tpu.memory_space<vmem>>, vector<32x128xbf16>
    %cst = arith.constant dense<0.000000e+00> : vector<8x128xf32>
    %2 = tpu.matmul %0, %1, %cst {dimension_numbers = #tpu.dot_dimension_numbers<[1], [0], [0], [1], [0, 0, 1, 1], [], []>} : vector<8x32xbf16>, vector<32x128xbf16>, vector<8x128xf32> -> vector<8x128xf32>
    %c0_3 = arith.constant 0 : index
    %c0_4 = arith.constant 0 : index
    %3 = vector.load %arg4[%c0_3, %c0_4] : memref<1x128xbf16, #tpu.memory_space<vmem>>, vector<1x128xbf16>
    %4 = arith.extf %3 : vector<1x128xbf16> to vector<1x128xf32>
    %5 = vector.broadcast %4 : vector<1x128xf32> to vector<8x128xf32>
    %6 = arith.addf %2, %5 : vector<8x128xf32>
    %cst_5 = arith.constant 5.000000e-01 : f32
    %7 = vector.broadcast %cst_5 : f32 to vector<8x128xf32>
    %8 = arith.mulf %7, %6 : vector<8x128xf32>
    %9 = arith.mulf %6, %6 : vector<8x128xf32>
    %10 = arith.mulf %9, %6 : vector<8x128xf32>
    %cst_6 = arith.constant 4.471500e-02 : f32
    %11 = vector.broadcast %cst_6 : f32 to vector<8x128xf32>
    %12 = arith.mulf %11, %10 : vector<8x128xf32>
    %13 = arith.addf %6, %12 : vector<8x128xf32>
    %cst_7 = arith.constant 0.797884583 : f32
    %14 = vector.broadcast %cst_7 : f32 to vector<8x128xf32>
    %15 = arith.mulf %14, %13 : vector<8x128xf32>
    %16 = math.tanh %15 : vector<8x128xf32>
    %cst_8 = arith.constant 1.000000e+00 : f32
    %17 = vector.broadcast %cst_8 : f32 to vector<8x128xf32>
    %18 = arith.addf %17, %16 : vector<8x128xf32>
    %19 = arith.mulf %8, %18 : vector<8x128xf32>
    %20 = arith.truncf %19 : vector<8x128xf32> to vector<8x128xbf16>
    %c0_9 = arith.constant 0 : index
    %c0_10 = arith.constant 0 : index
    %21 = vector.load %arg5[%c0_9, %c0_10] : memref<8x128xbf16, #tpu.memory_space<vmem>>, vector<8x128xbf16>
    tpu.vector_store %arg5[%c0_9, %c0_10], %20 {strides = array<i32>} : memref<8x128xbf16, #tpu.memory_space<vmem>>, vector<8x128xbf16>,
    return
  }
  func.func @transform_0(%arg0: i32, %arg1: i32) -> (i32, i32) {
    %c0_i32 = arith.constant 0 : i32
    %c0_i32_0 = arith.constant 0 : i32
    return %arg0, %c0_i32 : i32, i32
  }
  func.func @transform_1(%arg0: i32, %arg1: i32) -> (i32, i32) {
    %c0_i32 = arith.constant 0 : i32
    %c0_i32_0 = arith.constant 0 : i32
    return %c0_i32, %arg1 : i32, i32
  }
  func.func @transform_2(%arg0: i32, %arg1: i32) -> (i32, i32) {
    %c0_i32 = arith.constant 0 : i32
    %c0_i32_0 = arith.constant 0 : i32
    return %c0_i32, %arg1 : i32, i32
  }
  func.func @transform_3(%arg0: i32, %arg1: i32) -> (i32, i32) {
    %c0_i32 = arith.constant 0 : i32
    return %arg0, %arg1 : i32, i32
  }
}

module attributes {stable_mosaic.version = 11 : i64} {
  func.func @_head_kernel(%arg0: i32, %arg1: memref<2x32xbf16, #tpu.memory_space<vmem>>, %arg2: memref<32x32xbf16, #tpu.memory_space<vmem>>, %arg3: memref<1x32xbf16, #tpu.memory_space<vmem>>, %arg4: memref<32x1xbf16, #tpu.memory_space<vmem>>, %arg5: memref<1x1xbf16, #tpu.memory_space<vmem>>, %arg6: memref<2x1xf32, #tpu.memory_space<vmem>>) attributes {dimension_semantics = [#tpu.dimension_semantics<parallel>], iteration_bounds = array<i64: 1>, scalar_prefetch = 0 : i64, scratch_operands = 0 : i64, tpu.core_type = #tpu.core_type<tc>, window_params = [{transform_indices = @transform_0, window_bounds = array<i64: 2, 32>}, {pipeline_mode = #tpu.pipeline_mode<synchronous>, transform_indices = @transform_1, window_bounds = array<i64: 32, 32>}, {pipeline_mode = #tpu.pipeline_mode<synchronous>, transform_indices = @transform_2, window_bounds = array<i64: 1, 32>}, {pipeline_mode = #tpu.pipeline_mode<synchronous>, transform_indices = @transform_3, window_bounds = array<i64: 32, 1>}, {pipeline_mode = #tpu.pipeline_mode<synchronous>, transform_indices = @transform_4, window_bounds = array<i64: 1, 1>}, {transform_indices = @transform_5, window_bounds = array<i64: 2, 1>}]} {
    %c0 = arith.constant 0 : index
    %c0_0 = arith.constant 0 : index
    %0 = vector.load %arg1[%c0, %c0_0] : memref<2x32xbf16, #tpu.memory_space<vmem>>, vector<2x32xbf16>
    %c0_1 = arith.constant 0 : index
    %c0_2 = arith.constant 0 : index
    %1 = vector.load %arg2[%c0_1, %c0_2] : memref<32x32xbf16, #tpu.memory_space<vmem>>, vector<32x32xbf16>
    %cst = arith.constant dense<0.000000e+00> : vector<2x32xf32>
    %2 = tpu.matmul %0, %1, %cst {dimension_numbers = #tpu.dot_dimension_numbers<[1], [0], [0], [1], [0, 0, 1, 1], [], []>} : vector<2x32xbf16>, vector<32x32xbf16>, vector<2x32xf32> -> vector<2x32xf32>
    %c0_3 = arith.constant 0 : index
    %c0_4 = arith.constant 0 : index
    %3 = vector.load %arg3[%c0_3, %c0_4] : memref<1x32xbf16, #tpu.memory_space<vmem>>, vector<1x32xbf16>
    %4 = arith.extf %3 : vector<1x32xbf16> to vector<1x32xf32>
    %5 = vector.broadcast %4 : vector<1x32xf32> to vector<2x32xf32>
    %6 = arith.addf %2, %5 : vector<2x32xf32>
    %7 = math.tanh %6 : vector<2x32xf32>
    %8 = arith.truncf %7 : vector<2x32xf32> to vector<2x32xbf16>
    %c0_5 = arith.constant 0 : index
    %c0_6 = arith.constant 0 : index
    %9 = vector.load %arg4[%c0_5, %c0_6] : memref<32x1xbf16, #tpu.memory_space<vmem>>, vector<32x1xbf16>
    %cst_7 = arith.constant dense<0.000000e+00> : vector<2x1xf32>
    %10 = tpu.matmul %8, %9, %cst_7 {dimension_numbers = #tpu.dot_dimension_numbers<[1], [0], [0], [1], [0, 0, 1, 1], [], []>} : vector<2x32xbf16>, vector<32x1xbf16>, vector<2x1xf32> -> vector<2x1xf32>
    %c0_8 = arith.constant 0 : index
    %c0_9 = arith.constant 0 : index
    %11 = vector.load %arg5[%c0_8, %c0_9] : memref<1x1xbf16, #tpu.memory_space<vmem>>, vector<1x1xbf16>
    %12 = arith.extf %11 : vector<1x1xbf16> to vector<1x1xf32>
    %13 = vector.broadcast %12 : vector<1x1xf32> to vector<2x1xf32>
    %14 = arith.addf %10, %13 : vector<2x1xf32>
    %cst_10 = arith.constant 0.000000e+00 : f32
    %15 = vector.broadcast %cst_10 : f32 to vector<2x1xf32>
    %16 = arith.maximumf %14, %15 : vector<2x1xf32>
    %c0_11 = arith.constant 0 : index
    %c0_12 = arith.constant 0 : index
    %17 = vector.load %arg6[%c0_11, %c0_12] : memref<2x1xf32, #tpu.memory_space<vmem>>, vector<2x1xf32>
    tpu.vector_store %arg6[%c0_11, %c0_12], %16 {strides = array<i32>} : memref<2x1xf32, #tpu.memory_space<vmem>>, vector<2x1xf32>,
    return
  }
  func.func @transform_0(%arg0: i32) -> (i32, i32) {
    %c0_i32 = arith.constant 0 : i32
    %c0_i32_0 = arith.constant 0 : i32
    return %arg0, %c0_i32 : i32, i32
  }
  func.func @transform_1(%arg0: i32) -> (i32, i32) {
    %c0_i32 = arith.constant 0 : i32
    %c0_i32_0 = arith.constant 0 : i32
    %c0_i32_1 = arith.constant 0 : i32
    return %c0_i32, %c0_i32_0 : i32, i32
  }
  func.func @transform_2(%arg0: i32) -> (i32, i32) {
    %c0_i32 = arith.constant 0 : i32
    %c0_i32_0 = arith.constant 0 : i32
    %c0_i32_1 = arith.constant 0 : i32
    return %c0_i32, %c0_i32_0 : i32, i32
  }
  func.func @transform_3(%arg0: i32) -> (i32, i32) {
    %c0_i32 = arith.constant 0 : i32
    %c0_i32_0 = arith.constant 0 : i32
    %c0_i32_1 = arith.constant 0 : i32
    return %c0_i32, %c0_i32_0 : i32, i32
  }
  func.func @transform_4(%arg0: i32) -> (i32, i32) {
    %c0_i32 = arith.constant 0 : i32
    %c0_i32_0 = arith.constant 0 : i32
    %c0_i32_1 = arith.constant 0 : i32
    return %c0_i32, %c0_i32_0 : i32, i32
  }
  func.func @transform_5(%arg0: i32) -> (i32, i32) {
    %c0_i32 = arith.constant 0 : i32
    %c0_i32_0 = arith.constant 0 : i32
    return %arg0, %c0_i32 : i32, i32
  }
}

</mosaic_0001>

<bundles_post_ra>
// kernel: regressor_forward.13
= control target key start
LH: loop header
LB: loop body
LE: loop exit
PB: predicated region body
PF: predicated region fallthrough
CT: control target
= control target key end

     0   :  { %s486_s12 = smov 0   ;;  %s488_s13 = smov 0   ;;  %s528_s0 = inlined_call_operand.vmem [shape: bf16[16,32], index: 0, kind: input, shape index: {}]   ;;  %s529_s1 = inlined_call_operand.vmem [shape: bf16[32,96], index: 1, kind: input, shape index: {}]   ;;  %s530_s2 = inlined_call_operand.vmem [shape: bf16[1,96], index: 2, kind: input, shape index: {}]   ;;  %s531_s3 = inlined_call_operand.vmem [shape: bf16[16,96], index: 3, kind: output, shape index: {}]  }
   0x1   :  { %s490_s14 = smov 0  }
   0x2 LB: > { %s25_s15 = sadd.s32 1, %s458_s13  ;;  %p393_p0 = scmp.ge.s32.totalorder %s462_s14, 1  ;;  %s462_s14 = sphi %s490_s14, %s13_s14   ;;  %s458_s13 = sphi %s488_s13, %s533_s13   ;;  %s454_s12 = sphi %s486_s12, %s532_s12  }
   0x3   : > { %p27_p1 = scmp.ge.s32.totalorder %s25_s15, 2  ;;  %p167_p2 = scmp.lt.s32.totalorder %s462_s14, 3 }
   0x5   : > { %s535_s15 = smov (%p27_p1, %s25_s15), 0  ;;  %p168_p3 = pnand %p393_p0, %p167_p2 }
   0x6   : > { %p199_p4 = scmp.lt.s32.totalorder (!%p168_p3), %s454_s12, 1 }
   0x7   : > { %171 = sbr.rel (%p168_p3) target bundleno = 220 (0xdc), region = 32 }
   0xc   : > { %v438_v0 = vld [vmem:[%s529_s1 + $0x8] sm:$0xff]   ;;  %v464_v1 = vmov 0.0   ;;  %v439_v2 = vld [vmem:[%s529_s1] sm:$0xff]   ;;  %vm465_vm0 = vmmov 0   ;;  %s537_s12 = smov (!%p199_p4, %s454_s12), 1  ;;  %vm241_vm1 = vcmask 261120   ;;  %v225_v4 = vlaneseq }
   0xd   : > { %404 = vmatprep.subr.bf16.mxu0 %v464_v1  ;;  %408 = vmatprep.mubr.msk.bf16.mxu0 %vm465_vm0, %v464_v1  ;;  %s394_s20 = sshll.u32 %s537_s12, 2  ;;  %v223_v6 = vld [vmem:[%s530_s2] sm:$0x1]  ;;  %vm286_vm2 = vcmask 781312  }
   0xe   : > { %405 = vmatpush3.bf16.msra.mxu0 %v438_v0  ;;  %s202_s23 = scalar_lea.vmem %s528_s0, %s394_s20  ;;  %v226_v5 = vshrl.u32 %v225_v4, 7  ;;  %v224_v7 = vunpack.c.l.bf16 %v223_v6  ;;  %s216_s28 = scalar_lea.vmem %s531_s3, %s394_s20 }
   0xf   : > { %406 = vmatprep.subr.bf16.mxu0 %v464_v1  ;;  %v218_v3 = vld [vmem:[%s202_s23] sm:$0xf] }
  0x10   : > { %v227_v8 = vsub.s32 0, %v226_v5 }
  0x12   : > { %407 = vmatpush3.bf16.msra.mxu0 %v439_v2  ;;  %v228_v9 = vrot.slane %v224_v7, %v227_v8 }
  0x15   : > { %409 = vmatmul.mubr.msk.bf16.vlgmr.msra.gmra.mxu0 %vm241_vm1, %v218_v3 }
  0xd5   : > { %v279_v10 = vpop.f32.mrf.mxu0 }
  0xd6   : > { %v280_v11 = vadd.f32 %v279_v10, %v228_v9 }
  0xd7   : > { %v410_v12 = vpop.f32.mrf.mxu0 }
  0xd8   : > { %v285_v13 = vpack.c.bf16 %v280_v11, %v280_v11 }
  0xd9   : > { %v282_v14 = vpop.f32.mrf.mxu0 }
  0xda   : > { %287 = vst.msk [vmem:[%s216_s28] sm:$0xf] %vm286_vm2, %v285_v13 }
  0xdb   : > { %v411_v15 = vpop.f32.mrf.mxu0 }
  0xdc PF: > { %s13_s14 = sadd.s32 1, %s462_s14   ;;  %s532_s12 = smov %s458_s13 }
  0xdd   : > { %p10_p5 = scmp.ge.s32.totalorder %s13_s14, 4   ;;  %s533_s13 = smov %s535_s15 }
  0xdf   :  { %12 = sbr.rel (!%p10_p5) target bundleno = 2 (0x2), region = 68 }

// kernel: regressor_forward.12
= control target key start
LH: loop header
LB: loop body
LE: loop exit
PB: predicated region body
PF: predicated region fallthrough
CT: control target
= control target key end

     0   :  { %s304_s12 = smov 0   ;;  %s327_s0 = inlined_call_operand.vmem [shape: bf16[16,32], index: 0, kind: input, shape index: {}]   ;;  %s328_s1 = inlined_call_operand.vmem [shape: f32[1,32], index: 1, kind: input, shape index: {}]   ;;  %s329_s2 = inlined_call_operand.vmem [shape: f32[1,32], index: 2, kind: input, shape index: {}]   ;;  %s330_s3 = inlined_call_operand.vmem [shape: bf16[16,32], index: 3, kind: output, shape index: {}]  }
   0x1 LB: > { %s255_s13 = sadd.s32 4294967295, %s282_s12   ;;  %p259_p0 = scmp.ge.s32.totalorder %s282_s12, 1  ;;  %s282_s12 = sphi %s304_s12, %s13_s12  }
   0x2   : > { %p136_p1 = scmp.lt.s32.totalorder %s282_s12, 3 }
   0x4   : > { %p137_p2 = pnand %p259_p0, %p136_p1 }
   0x5   : > { %p158_p3 = scmp.lt.s32.totalorder (!%p137_p2), %s255_s13, 1 }
   0x6   : > { %140 = sbr.rel (%p137_p2) target bundleno = 328 (0x148), region = 32 }
   0xb   : > { %s332_s13 = smov (!%p158_p3, %s255_s13), 1  ;;  %vm168_vm0 = vcmask 261120   ;;  %v262_v12 = vld [vmem:[%s328_s1] ss:$0 sm:$0xff]  ;;  %vm200_vm1 = vcmask 257024  }
   0xc   : > { %s260_s14 = sshll.u32 %s332_s13, 2  ;;  %v263_v14 = vld [vmem:[%s329_s2] ss:$0 sm:$0xff] }
   0xd   : > { %s161_s17 = scalar_lea.vmem %s327_s0, %s260_s14  ;;  %s165_s24 = scalar_lea.vmem %s330_s3, %s260_s14 }
   0xe   : > { %v166_v0 = vld [vmem:[%s161_s17] sm:$0xf] }
   0xf   : > { %v167_v1 = vunpack.c.l.bf16 %v166_v0 }
  0x11   : > { %v169_v2 = vsel %vm168_vm0, %v167_v1, 0.0 }
  0x12   : > { %170 = vadd.xlane.f32.xlu0 %v169_v2 }
  0x9b   : > { %v171_v3 = vpop.xlane.xlu0 %170 }
  0x9c   : > { %v173_v4 = vmul.f32 0.03125, %v171_v3 }
  0x9e   : > { %v174_v5 = vsub.f32 %v167_v1, %v173_v4 }
  0xa0   : > { %v175_v6 = vmul.f32 %v174_v5, %v174_v5 }
  0xa2   : > { %v176_v7 = vsel %vm168_vm0, %v175_v6, 0.0 }
  0xa3   : > { %177 = vadd.xlane.f32.xlu0 %v176_v7 }
 0x12c   : > { %v178_v8 = vpop.xlane.xlu0 %177 }
 0x12d   : > { %v179_v9 = vmul.f32 0.03125, %v178_v8 }
 0x12f   : > { %v180_v10 = vadd.f32 1e-12, %v179_v9 }
 0x131   : > { %274 = vrsqrt.f32 %v180_v10 }
 0x13e   : > { %v275_v11 = vpop.eup %274 }
 0x13f   : > { %v182_v13 = vmul.f32 %v275_v11, %v174_v5 }
 0x141   : > { %v190_v15 = vmul.f32 %v262_v12, %v182_v13 }
 0x143   : > { %v198_v16 = vadd.f32 %v263_v14, %v190_v15 }
 0x145   : > { %v199_v17 = vpack.c.bf16 %v198_v16, %v198_v16 }
 0x147   : > { %201 = vst.msk [vmem:[%s165_s24] sm:$0xf] %vm200_vm1, %v199_v17 }
 0x148 PF: > { %s13_s12 = sadd.s32 1, %s282_s12  }
 0x149   : > { %p10_p4 = scmp.ge.s32.totalorder %s13_s12, 4  }
 0x14b   :  { %12 = sbr.rel (!%p10_p4) target bundleno = 1 (0x1), region = 62 }

// kernel: regressor_forward.15
= control target key start
LH: loop header
LB: loop body
LE: loop exit
PB: predicated region body
PF: predicated region fallthrough
CT: control target
= control target key end

     0   :  { %s518_s21 = smov 0   ;;  %s561_s0 = inlined_call_operand.vmem [shape: bf16[16,32], index: 0, kind: input, shape index: {}]   ;;  %s562_s1 = inlined_call_operand.vmem [shape: bf16[32,32], index: 1, kind: input, shape index: {}]   ;;  %s563_s2 = inlined_call_operand.vmem [shape: bf16[1,32], index: 2, kind: input, shape index: {}]   ;;  %s564_s3 = inlined_call_operand.vmem [shape: bf16[16,32], index: 3, kind: input, shape index: {}]   ;;  %s565_s4 = inlined_call_operand.vmem [shape: f32[1,32], index: 4, kind: input, shape index: {}]   ;;  %s566_s5 = inlined_call_operand.vmem [shape: f32[1,32], index: 5, kind: input, shape index: {}]   ;;  %s567_s6 = inlined_call_operand.vmem [shape: bf16[16,32], index: 6, kind: output, shape index: {}]  }
   0x1 LB: > { %s433_s22 = sadd.s32 4294967295, %s479_s21   ;;  %p437_p0 = scmp.ge.s32.totalorder %s479_s21, 1  ;;  %s479_s21 = sphi %s518_s21, %s16_s21  }
   0x2   : > { %p220_p1 = scmp.lt.s32.totalorder %s479_s21, 3 }
   0x4   : > { %p221_p2 = pnand %p437_p0, %p220_p1 }
   0x5   : > { %p252_p3 = scmp.lt.s32.totalorder (!%p221_p2), %s433_s22, 1 }
   0x6   : > { %224 = sbr.rel (%p221_p2) target bundleno = 528 (0x210), region = 44 }
   0xb   : > { %v469_v0 = vld [vmem:[%s562_s1 + $0x8] sm:$0xff]   ;;  %v481_v1 = vmov 0.0   ;;  %v470_v2 = vld [vmem:[%s562_s1] sm:$0xff]   ;;  %vm482_vm0 = vmmov 0   ;;  %s569_s22 = smov (!%p252_p3, %s433_s22), 1  ;;  %vm288_vm1 = vcmask 261120   ;;  %v272_v4 = vlaneseq }
   0xc   : > { %451 = vmatprep.subr.bf16.mxu0 %v481_v1  ;;  %455 = vmatprep.mubr.msk.bf16.mxu0 %vm482_vm0, %v481_v1  ;;  %s532_s27 = sshll.u32 %s569_s22, 2  ;;  %v270_v6 = vld [vmem:[%s563_s2] sm:$0x1]  ;;  %vm366_vm2 = vcmask 257024  }
   0xd   : > { %452 = vmatpush3.bf16.msra.mxu0 %v469_v0  ;;  %s255_s30 = scalar_lea.vmem %s561_s0, %s532_s27  ;;  %v273_v5 = vshrl.u32 %v272_v4, 7  ;;  %v271_v7 = vunpack.c.l.bf16 %v270_v6  ;;  %s259_s11 = scalar_lea.vmem %s564_s3, %s532_s27  ;;  %v444_v28 = vld [vmem:[%s565_s4] ss:$0 sm:$0xff] }
   0xe   : > { %453 = vmatprep.subr.bf16.mxu0 %v481_v1  ;;  %v265_v3 = vld [vmem:[%s255_s30] sm:$0xf]  ;;  %s263_s18 = scalar_lea.vmem %s567_s6, %s532_s27 }
   0xf   : > { %v274_v8 = vsub.s32 0, %v273_v5  ;;  %v332_v9 = vld [vmem:[%s259_s11] sm:$0xf] }
  0x10   : > { %v333_v11 = vunpack.c.l.bf16 %v332_v9  ;;  %v445_v30 = vld [vmem:[%s566_s5] ss:$0 sm:$0xff] }
  0x11   : > { %454 = vmatpush3.bf16.msra.mxu0 %v470_v2  ;;  %v275_v10 = vrot.slane %v271_v7, %v274_v8 }
  0x14   : > { %456 = vmatmul.mubr.msk.bf16.vlgmr.msra.gmra.mxu0 %vm288_vm1, %v265_v3 }
  0xd4   : > { %v326_v12 = vpop.f32.mrf.mxu0 }
  0xd5   : > { %v327_v13 = vadd.f32 %v326_v12, %v275_v10 }
  0xd6   : > { %v457_v14 = vpop.f32.mrf.mxu0 }
  0xd7   : > { %v334_v15 = vadd.f32 %v333_v11, %v327_v13 }
  0xd8   : > { %v329_v16 = vpop.f32.mrf.mxu0 }
  0xd9   : > { %v335_v17 = vsel %vm288_vm1, %v334_v15, 0.0 }
  0xda   : > { %336 = vadd.xlane.f32.xlu0 %v335_v17  ;;  %v458_v18 = vpop.f32.mrf.mxu0 }
 0x163   : > { %v337_v19 = vpop.xlane.xlu0 %336 }
 0x164   : > { %v339_v20 = vmul.f32 0.03125, %v337_v19 }
 0x166   : > { %v340_v21 = vsub.f32 %v334_v15, %v339_v20 }
 0x168   : > { %v341_v22 = vmul.f32 %v340_v21, %v340_v21 }
 0x16a   : > { %v342_v23 = vsel %vm288_vm1, %v341_v22, 0.0 }
 0x16b   : > { %343 = vadd.xlane.f32.xlu0 %v342_v23 }
 0x1f4   : > { %v344_v24 = vpop.xlane.xlu0 %343 }
 0x1f5   : > { %v345_v25 = vmul.f32 0.03125, %v344_v24 }
 0x1f7   : > { %v346_v26 = vadd.f32 1e-12, %v345_v25 }
 0x1f9   : > { %471 = vrsqrt.f32 %v346_v26 }
 0x206   : > { %v472_v27 = vpop.eup %471 }
 0x207   : > { %v348_v29 = vmul.f32 %v472_v27, %v340_v21 }
 0x209   : > { %v356_v31 = vmul.f32 %v444_v28, %v348_v29 }
 0x20b   : > { %v364_v32 = vadd.f32 %v445_v30, %v356_v31 }
 0x20d   : > { %v365_v33 = vpack.c.bf16 %v364_v32, %v364_v32 }
 0x20f   : > { %367 = vst.msk [vmem:[%s263_s18] sm:$0xf] %vm366_vm2, %v365_v33 }
 0x210 PF: > { %s16_s21 = sadd.s32 1, %s479_s21  }
 0x211   : > { %p13_p4 = scmp.ge.s32.totalorder %s16_s21, 4  }
 0x213   :  { %15 = sbr.rel (!%p13_p4) target bundleno = 1 (0x1), region = 77 }

// kernel: regressor_forward.14
= control target key start
LH: loop header
LB: loop body
LE: loop exit
PB: predicated region body
PF: predicated region fallthrough
CT: control target
= control target key end

     0   :  { %s1128_s9 = smov 0   ;;  %s1361_s0 = inlined_call_operand.vmem [shape: bf16[2,8,6,16], index: 0, kind: input, shape index: {}]   ;;  %s1362_s1 = inlined_call_operand.vmem [shape: f32[2,1,8], index: 1, kind: input, shape index: {}]   ;;  %s1363_s2 = inlined_call_operand.vmem [shape: bf16[2,8,2,16], index: 2, kind: output, shape index: {}]  }
   0x1 LB: > { %s931_s10 = sadd.s32 4294967295, %s1108_s9   ;;  %p935_p0 = scmp.ge.s32.totalorder %s1108_s9, 1  ;;  %s1108_s9 = sphi %s1128_s9, %s12_s9  }
   0x2   : > { %p120_p1 = scmp.lt.s32.totalorder %s1108_s9, 3 }
   0x4   : > { %p121_p2 = pnand %p935_p0, %p120_p1 }
   0x5   : > { %p144_p3 = scmp.lt.s32.totalorder (!%p121_p2), %s931_s10, 1 }
   0x6   : > { %124 = sbr.rel (%p121_p2) target bundleno = 967 (0x3c7), region = 28 }
   0xb   : > { %v1110_v0 = vmov 0.0   ;;  %s1369_s10 = smov (!%p144_p3, %s931_s10), 1  ;;  %vm1111_vm0 = vmmov 0   ;;  %vm221_vm1 = vcmask 1041409   ;;  %vm224_vm2 = vcmask 1042434  }
   0xc   : > { %1011 = vmatprep.subr.bf16.mxu0 %v1110_v0  ;;  %1017 = vmatprep.subr.bf16.mxu1 %v1110_v0  ;;  %s1002_s11 = sshll.u32 %s1369_s10, 5  ;;  %vm227_vm3 = vcmask 1043459   ;;  %vm230_vm4 = vcmask 1044484   ;;  %vm233_vm5 = vcmask 1045509   ;;  %vm236_vm6 = vcmask 1046534   ;;  %s151_s17 = scalar_lea.vmem %s1362_s1, %s1369_s10 }
   0xd   : > { %1013 = vmatprep.mubr.msk.bf16.mxu0 %vm1111_vm0, %v1110_v0  ;;  %1019 = vmatprep.mubr.msk.bf16.mxu1 %vm1111_vm0, %v1110_v0  ;;  %s1148_s14 = scalar_lea.vmem %s1361_s0, %s1002_s11  ;;  %vm239_vm7 = vcmask 1047559   ;;  %vm289_vm8 = vcmask 130048   ;;  %vm336_vm9 = vcmask 64512   ;;  %vm399_vm10 = vcmask 1043456   ;;  %s938_s18 = sshll.u32 %s1369_s10, 3 }
   0xe   : > { %v1046_v1 = vld [vmem:[%s1148_s14] ss:$0 sps:$4 sm:$0x22]   ;;  %v1047_v2 = vld [vmem:[%s1148_s14 + $0x4] ss:$0 sps:$4 sm:$0x22]   ;;  %s1273_s21 = scalar_lea.vmem %s1363_s2, %s938_s18 }
   0xf   : > { %v1048_v3 = vld [vmem:[%s1148_s14 + $0x8] ss:$0 sps:$4 sm:$0x22]   ;;  %v1049_v4 = vld [vmem:[%s1148_s14 + $0xc] ss:$0 sps:$4 sm:$0x22]   ;;  %v266_v7 = vunpack.c.l.b16 %v1046_v1  ;;  %v267_v8 = vunpack.c.l.b16 %v1047_v2 }
  0x10   : > { %v1050_v5 = vld [vmem:[%s1148_s14 + $0x10] ss:$0 sps:$4 sm:$0x22]   ;;  %v1051_v6 = vld [vmem:[%s1148_s14 + $0x14] ss:$0 sps:$4 sm:$0x22]   ;;  %v268_v11 = vunpack.c.l.b16 %v1048_v3  ;;  %v269_v12 = vunpack.c.l.b16 %v1049_v4 }
  0x11   : > { %v1052_v9 = vld [vmem:[%s1148_s14 + $0x18] ss:$0 sps:$4 sm:$0x22]   ;;  %v1053_v10 = vld [vmem:[%s1148_s14 + $0x1c] ss:$0 sps:$4 sm:$0x22]   ;;  %v270_v13 = vunpack.c.l.b16 %v1050_v5  ;;  %v271_v14 = vunpack.c.l.b16 %v1051_v6 }
  0x12   : > { %v274_v15 = vrot.slane %v266_v7, 2  ;;  %v275_v16 = vrot.slane %v267_v8, 1  ;;  %v272_v17 = vunpack.c.l.b16 %v1052_v9  ;;  %v273_v18 = vunpack.c.l.b16 %v1053_v10  ;;  %v1054_v27 = vld [vmem:[%s1148_s14] ss:$0 sps:$4 sm:$0x11]  }
  0x13   : > { %v278_v19 = vrot.slane %v269_v12, 7  ;;  %v280_v21 = vrot.slane %v270_v13, 6  ;;  %v282_v22 = vrot.slane %v271_v14, 5  ;;  %v1055_v28 = vld [vmem:[%s1148_s14 + $0x4] ss:$0 sps:$4 sm:$0x11]   ;;  %v212_v35 = vunpack.c.l.b16 %v1054_v27 }
  0x14   : > { %v276_v20 = vsel %vm221_vm1, %v275_v16, %v274_v15  ;;  %v284_v24 = vrot.slane %v272_v17, 4  ;;  %v286_v25 = vrot.slane %v273_v18, 3  ;;  %v1056_v30 = vld [vmem:[%s1148_s14 + $0x8] ss:$0 sps:$4 sm:$0x11]   ;;  %v213_v36 = vunpack.c.l.b16 %v1055_v28 }
  0x15   : > { %v277_v23 = vsel %vm224_vm2, %v268_v11, %v276_v20  ;;  %v1057_v31 = vld [vmem:[%s1148_s14 + $0xc] ss:$0 sps:$4 sm:$0x11]   ;;  %v1058_v33 = vld [vmem:[%s1148_s14 + $0x10] ss:$0 sps:$4 sm:$0x11]   ;;  %v214_v40 = vunpack.c.l.b16 %v1056_v30 }
  0x16   : > { %v279_v26 = vsel %vm227_vm3, %v278_v19, %v277_v23  ;;  %v1059_v34 = vld [vmem:[%s1148_s14 + $0x14] ss:$0 sps:$4 sm:$0x11]   ;;  %v1060_v38 = vld [vmem:[%s1148_s14 + $0x18] ss:$0 sps:$4 sm:$0x11]   ;;  %v215_v41 = vunpack.c.l.b16 %v1057_v31  ;;  %v216_v43 = vunpack.c.l.b16 %v1058_v33 }
  0x17   : > { %v281_v29 = vsel %vm230_vm4, %v280_v21, %v279_v26  ;;  %v1061_v39 = vld [vmem:[%s1148_s14 + $0x1c] ss:$0 sps:$4 sm:$0x11]   ;;  %v217_v44 = vunpack.c.l.b16 %v1059_v34  ;;  %v220_v45 = vrot.slane %v213_v36, 7  ;;  %v218_v47 = vunpack.c.l.b16 %v1060_v38  ;;  %v1189_v1 = vld [vmem:[%s151_s17] ss:$0 sm:$0xff] }
  0x18   : > { %v283_v32 = vsel %vm233_vm5, %v282_v22, %v281_v29  ;;  %v219_v48 = vunpack.c.l.b16 %v1061_v39  ;;  %v223_v49 = vrot.slane %v214_v40, 6  ;;  %v226_v51 = vrot.slane %v215_v41, 5  ;;  %v1062_v8 = vld [vmem:[%s1148_s14] ss:$0 sps:$4 sm:$0x44]  }
  0x19   : > { %v285_v37 = vsel %vm236_vm6, %v284_v24, %v283_v32  ;;  %v222_v50 = vsel %vm221_vm1, %v220_v45, %v212_v35  ;;  %v229_v52 = vrot.slane %v216_v43, 4  ;;  %v232_v53 = vrot.slane %v217_v44, 3  ;;  %v1063_v9 = vld [vmem:[%s1148_s14 + $0x4] ss:$0 sps:$4 sm:$0x44]  }
  0x1a   : > { %v287_v42 = vsel %vm239_vm7, %v286_v25, %v285_v37  ;;  %v225_v55 = vsel %vm224_vm2, %v223_v49, %v222_v50  ;;  %v235_v56 = vrot.slane %v218_v47, 2  ;;  %v238_v57 = vrot.slane %v219_v48, 1  ;;  %v1064_v10 = vld [vmem:[%s1148_s14 + $0x8] ss:$0 sps:$4 sm:$0x44]  }
  0x1b   : > { %v288_v46 = vpack.c.b16 %v287_v42, %v287_v42  ;;  %v228_v58 = vsel %vm227_vm3, %v226_v51, %v225_v55  ;;  %v1065_v11 = vld [vmem:[%s1148_s14 + $0xc] ss:$0 sps:$4 sm:$0x44]   ;;  %v373_v12 = vunpack.c.l.b16 %v1062_v8  ;;  %v374_v13 = vunpack.c.l.b16 %v1063_v9  ;;  %v1066_v15 = vld [vmem:[%s1148_s14 + $0x10] ss:$0 sps:$4 sm:$0x44]  }
  0x1c   : > { %v231_v59 = vsel %vm230_vm4, %v229_v52, %v228_v58  ;;  %v375_v14 = vunpack.c.l.b16 %v1064_v10  ;;  %v1067_v16 = vld [vmem:[%s1148_s14 + $0x14] ss:$0 sps:$4 sm:$0x44]   ;;  %v376_v17 = vunpack.c.l.b16 %v1065_v11  ;;  %v1068_v18 = vld [vmem:[%s1148_s14 + $0x18] ss:$0 sps:$4 sm:$0x44]   ;;  %v377_v20 = vunpack.c.l.b16 %v1066_v15 }
  0x1d   : > { %v294_v54 = vsel %vm289_vm8, %v288_v46, 0  ;;  %v234_v60 = vsel %vm233_vm5, %v232_v53, %v231_v59  ;;  %v1069_v19 = vld [vmem:[%s1148_s14 + $0x1c] ss:$0 sps:$4 sm:$0x44]   ;;  %v378_v21 = vunpack.c.l.b16 %v1067_v16  ;;  %v381_v22 = vrot.slane %v373_v12, 4 }
  0x1e   : > { %1012 = vmatpush3.bf16.xpose.msra.mxu0 %v294_v54  ;;  %v237_v61 = vsel %vm236_vm6, %v235_v56, %v234_v60  ;;  %v382_v23 = vrot.slane %v374_v13, 3  ;;  %v1070_v24 = vld [vmem:[%s1148_s14] ss:$0 sps:$4 sm:$0x44]   ;;  %v379_v25 = vunpack.c.l.b16 %v1068_v18  ;;  %v380_v26 = vunpack.c.l.b16 %v1069_v19 }
  0x1f   : > { %1029 = vmatprep.subr.bf16.mxu0 %v1110_v0  ;;  %v240_v62 = vsel %vm239_vm7, %v238_v57, %v237_v61  ;;  %v384_v27 = vrot.slane %v375_v14, 2  ;;  %v386_v28 = vrot.slane %v376_v17, 1  ;;  %v1071_v29 = vld [vmem:[%s1148_s14 + $0x4] ss:$0 sps:$4 sm:$0x44]   ;;  %v389_v31 = vrot.slane %v378_v21, 7 }
  0x20   : > { %v241_v63 = vpack.c.b16 %v240_v62, %v240_v62  ;;  %v383_v30 = vsel %vm221_vm1, %v382_v23, %v381_v22  ;;  %v1072_v32 = vld [vmem:[%s1148_s14 + $0x8] ss:$0 sps:$4 sm:$0x44]   ;;  %v722_v33 = vunpack.c.l.b16 %v1070_v24  ;;  %v391_v35 = vrot.slane %v379_v25, 6 }
  0x21   : > { %v385_v34 = vsel %vm224_vm2, %v384_v27, %v383_v30  ;;  %v393_v36 = vrot.slane %v380_v26, 5  ;;  %v1073_v37 = vld [vmem:[%s1148_s14 + $0xc] ss:$0 sps:$4 sm:$0x44]   ;;  %v723_v38 = vunpack.c.l.b16 %v1071_v29  ;;  %v724_v42 = vunpack.c.l.b16 %v1072_v32 }
  0x22   : > { %v387_v39 = vsel %vm227_vm3, %v386_v28, %v385_v34  ;;  %v1074_v40 = vld [vmem:[%s1148_s14 + $0x10] ss:$0 sps:$4 sm:$0x44]   ;;  %v1075_v41 = vld [vmem:[%s1148_s14 + $0x14] ss:$0 sps:$4 sm:$0x44]   ;;  %v725_v46 = vunpack.c.l.b16 %v1073_v37 }
  0x23   : > { %v388_v43 = vsel %vm230_vm4, %v377_v20, %v387_v39  ;;  %v1076_v44 = vld [vmem:[%s1148_s14 + $0x18] ss:$0 sps:$4 sm:$0x44]   ;;  %v1077_v45 = vld [vmem:[%s1148_s14 + $0x1c] ss:$0 sps:$4 sm:$0x44]   ;;  %v726_v48 = vunpack.c.l.b16 %v1074_v40  ;;  %v727_v59 = vunpack.c.l.b16 %v1075_v41 }
  0x24   : > { %v390_v47 = vsel %vm233_vm5, %v389_v31, %v388_v43  ;;  %v730_v49 = vrot.slane %v722_v33, 5  ;;  %v728_v51 = vunpack.c.l.b16 %v1076_v44  ;;  %v729_v52 = vunpack.c.l.b16 %v1077_v45  ;;  %v1078_v11 = vld [vmem:[%s1148_s14] ss:$0 sps:$4 sm:$0x22]  }
  0x25   : > { %1014 = vmatmul.mubr.msk.bf16.vlgmr.msra.gmra.mxu0 %vm289_vm8, %v241_v63  ;;  %v392_v50 = vsel %vm236_vm6, %v391_v35, %v390_v47  ;;  %v731_v53 = vrot.slane %v723_v38, 4  ;;  %v733_v55 = vrot.slane %v724_v42, 3  ;;  %v735_v56 = vrot.slane %v725_v46, 2  ;;  %v1079_v12 = vld [vmem:[%s1148_s14 + $0x4] ss:$0 sps:$4 sm:$0x22]  }
  0x26   : > { %1031 = vmatprep.mubr.msk.bf16.mxu0 %vm1111_vm0, %v1110_v0  ;;  %v394_v54 = vsel %vm239_vm7, %v393_v36, %v392_v50  ;;  %v737_v57 = vrot.slane %v726_v48, 1  ;;  %v740_v62 = vrot.slane %v728_v51, 7  ;;  %v1080_v13 = vld [vmem:[%s1148_s14 + $0x8] ss:$0 sps:$4 sm:$0x22]   ;;  %v617_v14 = vunpack.c.l.b16 %v1078_v11 }
  0x27   : > { %v395_v58 = vpack.c.b16 %v394_v54, %v394_v54  ;;  %v732_v60 = vsel %vm221_vm1, %v731_v53, %v730_v49  ;;  %v618_v15 = vunpack.c.l.b16 %v1079_v12  ;;  %v619_v16 = vunpack.c.l.b16 %v1080_v13  ;;  %v1082_v19 = vld [vmem:[%s1148_s14 + $0x10] ss:$0 sps:$4 sm:$0x22]   ;;  %v1081_v20 = vld [vmem:[%s1148_s14 + $0xc] ss:$0 sps:$4 sm:$0x22]  }
  0x28   : > { %v734_v61 = vsel %vm224_vm2, %v733_v55, %v732_v60  ;;  %v625_v17 = vrot.slane %v617_v14, 3  ;;  %v1086_v21 = vld [vmem:[%s1148_s14] ss:$0 sps:$4 sm:$0x11]   ;;  %v621_v25 = vunpack.c.l.b16 %v1082_v19  ;;  %v620_v27 = vunpack.c.l.b16 %v1081_v20 }
  0x29   : > { %v401_v63 = vsel %vm399_vm10, %v395_v58, 0  ;;  %v626_v18 = vrot.slane %v618_v15, 2  ;;  %v628_v22 = vrot.slane %v619_v16, 1  ;;  %v1083_v23 = vld [vmem:[%s1148_s14 + $0x14] ss:$0 sps:$4 sm:$0x22]   ;;  %v570_v29 = vunpack.c.l.b16 %v1086_v21 }
  0x2a   : > { %1018 = vmatpush3.bf16.msra.mxu1 %v401_v63  ;;  %v1088_v26 = vld [vmem:[%s1148_s14 + $0x8] ss:$0 sps:$4 sm:$0x11]   ;;  %v1087_v28 = vld [vmem:[%s1148_s14 + $0x4] ss:$0 sps:$4 sm:$0x11]   ;;  %v622_v32 = vunpack.c.l.b16 %v1083_v23 }
  0x2b   : > { %1023 = vmatprep.subr.bf16.mxu1 %v1110_v0  ;;  %v627_v24 = vsel %vm221_vm1, %v626_v18, %v625_v17  ;;  %v1084_v30 = vld [vmem:[%s1148_s14 + $0x18] ss:$0 sps:$4 sm:$0x22]   ;;  %v1089_v33 = vld [vmem:[%s1148_s14 + $0xc] ss:$0 sps:$4 sm:$0x11]   ;;  %v572_v36 = vunpack.c.l.b16 %v1088_v26  ;;  %v571_v40 = vunpack.c.l.b16 %v1087_v28 }
  0x2c   : > { %v629_v31 = vsel %vm224_vm2, %v628_v22, %v627_v24  ;;  %v631_v35 = vrot.slane %v621_v25, 7  ;;  %v1085_v38 = vld [vmem:[%s1148_s14 + $0x1c] ss:$0 sps:$4 sm:$0x22]   ;;  %v578_v41 = vrot.slane %v570_v29, 1  ;;  %v623_v42 = vunpack.c.l.b16 %v1084_v30 }
  0x2d   : > { %v630_v39 = vsel %vm227_vm3, %v620_v27, %v629_v31  ;;  %v1090_v43 = vld [vmem:[%s1148_s14 + $0x10] ss:$0 sps:$4 sm:$0x11]   ;;  %v633_v45 = vrot.slane %v622_v32, 6  ;;  %v573_v46 = vunpack.c.l.b16 %v1089_v33  ;;  %v580_v48 = vrot.slane %v572_v36, 7 }
  0x2e   : > { %v632_v47 = vsel %vm230_vm4, %v631_v35, %v630_v39  ;;  %v624_v50 = vunpack.c.l.b16 %v1085_v38  ;;  %v1091_v51 = vld [vmem:[%s1148_s14 + $0x14] ss:$0 sps:$4 sm:$0x11]   ;;  %v574_v53 = vunpack.c.l.b16 %v1090_v43  ;;  %v1112_v20 = vmov 1966171168  }
  0x2f   : > { %v634_v54 = vsel %vm233_vm5, %v633_v45, %v632_v47  ;;  %v582_v55 = vrot.slane %v573_v46, 6  ;;  %v448_v21 = vunpack.c.l.s4 %v1112_v20  ;;  %v450_v22 = vlaneseq }
  0x30   : > { %v637_v58 = vrot.slane %v624_v50, 4  ;;  %vm495_vm11 = vcmask 122880   ;;  %vm496_vm12 = vsmask.f32 256  ;;  %v507_v50 = vld [vmem:[%s1273_s21 + $0x3] sm:$0x1] }
  0x31   : > { %v449_v23 = vunpack.c.0.s8 %v448_v21  ;;  %v451_v24 = vshrl.u32 %v450_v22, 7  ;;  %vm1278_vm13 = vmand %vm495_vm11, %vm496_vm12  ;;  %vm843_vm14 = vsmask.f32 7938 }
  0x32   : > { %vm1322_vm15 = vmand %vm495_vm11, %vm843_vm14 }
  0xe5   : > { %v330_v2 = vpop.f32.mrf.mxu0 }
  0xe6   : > { %v1192_v3 = vadd.f32 %v1189_v1, %v330_v2  ;;  %v736_v2 = vsel %vm227_vm3, %v735_v56, %v734_v61  ;;  %v1092_v56 = vld [vmem:[%s1148_s14 + $0x18] ss:$0 sps:$4 sm:$0x11]   ;;  %v584_v61 = vrot.slane %v574_v53, 5 }
  0xe7   : > { %v1015_v4 = vpop.f32.mrf.mxu0 }
  0xe8   : > { %v337_v5 = vsel %vm336_vm9, %v1192_v3, -inf  ;;  %v742_v4 = vrot.slane %v729_v52, 6  ;;  %v635_v52 = vrot.slane %v623_v42, 5  ;;  %v501_v42 = vld [vmem:[%s1273_s21 + $0x1] sm:$0x1] }
  0xe9   : > { %338 = vmax.xlane.f32.xlu0 %v337_v5  ;;  %v333_v6 = vpop.f32.mrf.mxu0  ;;  %v738_v5 = vsel %vm230_vm4, %v737_v57, %v736_v2  ;;  %v576_v2 = vunpack.c.l.b16 %v1092_v56 }
  0xea   : > { %v739_v6 = vsel %vm233_vm5, %v727_v59, %v738_v5  ;;  %v575_v59 = vunpack.c.l.b16 %v1091_v51  ;;  %v636_v60 = vsel %vm236_vm6, %v635_v52, %v634_v54  ;;  %v510_v51 = vld [vmem:[%s1273_s21 + $0x4] sm:$0x1]  ;;  %v513_v54 = vld [vmem:[%s1273_s21 + $0x5] sm:$0x1] }
  0xeb   : > { %v1016_v7 = vpop.f32.mrf.mxu0 }
  0xec   : > { %v741_v7 = vsel %vm236_vm6, %v740_v62, %v739_v6  ;;  %v1093_v62 = vld [vmem:[%s1148_s14 + $0x1c] ss:$0 sps:$4 sm:$0x11]   ;;  %v586_v5 = vrot.slane %v575_v59, 4 }
  0xed   : > { %v743_v8 = vsel %vm239_vm7, %v742_v4, %v741_v7  ;;  %v638_v4 = vsel %vm239_vm7, %v637_v58, %v636_v60  ;;  %v577_v7 = vunpack.c.l.b16 %v1093_v62 }
  0xee   : > { %v744_v9 = vpack.c.b16 %v743_v8, %v743_v8  ;;  %v639_v8 = vpack.c.b16 %v638_v4, %v638_v4 }
  0xef   : > { %v590_v11 = vrot.slane %v577_v7, 2 }
  0xf0   : > { %v749_v10 = vsel %vm399_vm10, %v744_v9, 0  ;;  %v588_v9 = vrot.slane %v576_v2, 3  ;;  %v644_v12 = vsel %vm289_vm8, %v639_v8, 0  ;;  %v519_v2 = vld [vmem:[%s1273_s21 + $0x7] sm:$0x1] }
  0xf1   : > { %1030 = vmatpush3.bf16.msra.mxu0 %v749_v10 }
 0x172   : > { %v339_v34 = vpop.xlane.xlu0 %338 }
 0x173   : > { %v340_v37 = vsub.f32 %v1192_v3, %v339_v34  ;;  %v579_v3 = vsel %vm221_vm1, %v571_v40, %v578_v41  ;;  %v498_v41 = vld [vmem:[%s1273_s21] sm:$0x1] }
 0x174   : > { %v581_v57 = vsel %vm224_vm2, %v580_v48, %v579_v3 }
 0x175   : > { %v341_v44 = vpack.c.bf16 %v340_v37, %v340_v37  ;;  %v583_v63 = vsel %vm227_vm3, %v582_v55, %v581_v57  ;;  %v516_v55 = vld [vmem:[%s1273_s21 + $0x6] sm:$0x1] }
 0x176   : > { %v585_v6 = vsel %vm230_vm4, %v584_v61, %v583_v63 }
 0x177   : > { %v343_v49 = vmul.bf16 1069105081, %v341_v44  ;;  %v587_v10 = vsel %vm233_vm5, %v586_v5, %v585_v6 }
 0x178   : > { %v589_v13 = vsel %vm236_vm6, %v588_v9, %v587_v10 }
 0x179   : > { %1094 = vpow.bf16 %v343_v49  ;;  %v591_v16 = vsel %vm239_vm7, %v590_v11, %v589_v13  ;;  %v504_v49 = vld [vmem:[%s1273_s21 + $0x2] sm:$0x1] }
 0x17a   : > { %v592_v18 = vpack.c.b16 %v591_v16, %v591_v16 }
 0x187   : > { %v1095_v14 = vpop.eup %1094 }
 0x188   : > { %1020 = vmatmul.mubr.msk.bf16.vlgmr.msra.gmra.mxu1 %vm336_vm9, %v1095_v14  ;;  %v345_v15 = vunpack.c.l.bf16 %v1095_v14 }
 0x189   : > { %1024 = vmatpush3.bf16.xpose.msra.mxu1 %v644_v12  ;;  %1025 = vmatprep.mubr.msk.bf16.mxu1 %vm1111_vm0, %v1110_v0  ;;  %v1266_v0 = vsub.s32 %v449_v23, %v451_v24 }
 0x18a   : > { %v346_v17 = vsel %vm336_vm9, %v345_v15, 0.0 }
 0x18b   : > { %347 = vadd.xlane.f32.xlu1 %v346_v17 }
 0x190   : > { %1026 = vmatmul.mubr.msk.bf16.vlgmr.msra.gmra.mxu1 %vm289_vm8, %v592_v18 }
 0x214   : > { %v348_v19 = vpop.xlane.xlu1 %347 }
 0x215   : > { %1096 = vrcp.f32 %v348_v19 }
 0x222   : > { %v1097_v25 = vpop.eup %1096 }
 0x248   : > { %v437_v26 = vpop.f32.mrf.mxu1 }
 0x249   : > { %v444_v27 = vmul.f32 %v1097_v25, %v437_v26 }
 0x24a   : > { %v1021_v28 = vpop.f32.mrf.mxu1 }
 0x24b   : > { %v445_v29 = vpack.c.bf16 %v444_v27, %v444_v27 }
 0x24c   : > { %v440_v30 = vpop.f32.mrf.mxu1 }
 0x24d   : > { %v453_v31 = vrot.slane %v445_v29, %v1266_v0 }
 0x24e   : > { %v1022_v32 = vpop.f32.mrf.mxu1 }
 0x24f   : > { %v454_v33 = vcombine.high %v453_v31, %v453_v31  ;;  %v461_v34 = vrot.slane %v453_v31, %v1266_v0 }
 0x250   : > { %v680_v35 = vpop.f32.mrf.mxu1 }
 0x251   : > { %v468_v36 = vrot.slane %v454_v33, %v1266_v0  ;;  %v469_v37 = vcombine.high %v461_v34, %v461_v34  ;;  %v472_v38 = vunpack.i.h.s16 %v461_v34  ;;  %v966_v39 = vpack.i.b16 %v461_v34, %v461_v34 }
 0x252   : > { %v681_v43 = vadd.f32 %v1189_v1, %v680_v35  ;;  %v1027_v44 = vpop.f32.mrf.mxu1 }
 0x253   : > { %v470_v45 = vcombine.high %v468_v36, %v468_v36  ;;  %v474_v46 = vunpack.i.h.s16 %v468_v36  ;;  %v476_v47 = vunpack.i.h.s16 %v469_v37  ;;  %v480_v48 = vpack.i.b16 %v472_v38, %v472_v38 }
 0x254   : > { %v967_v3 = vpack.i.b16 %v468_v36, %v468_v36  ;;  %v968_v52 = vpack.i.b16 %v469_v37, %v469_v37  ;;  %v499_v53 = vsel %vm1278_vm13, %v966_v39, %v498_v41  ;;  %v686_v1 = vsel %vm336_vm9, %v681_v43, -inf  ;;  %v683_v56 = vpop.f32.mrf.mxu1 }
 0x255   : > { %v478_v57 = vunpack.i.h.s16 %v470_v45  ;;  %v482_v58 = vpack.i.b16 %v474_v46, %v474_v46  ;;  %v484_v59 = vpack.i.b16 %v476_v47, %v476_v47  ;;  %v969_v60 = vpack.i.b16 %v470_v45, %v470_v45  ;;  %500 = vst [vmem:[%s1273_s21] sm:$0x1] %v499_v53  ;;  %687 = vmax.xlane.f32.xlu0 %v686_v1 }
 0x256   : > { %v502_v61 = vsel %vm1278_vm13, %v480_v48, %v501_v42  ;;  %v505_v62 = vsel %vm1278_vm13, %v967_v3, %v504_v49  ;;  %v511_v63 = vsel %vm1278_vm13, %v968_v52, %v510_v51  ;;  %v1028_v4 = vpop.f32.mrf.mxu1 }
 0x257   : > { %v486_v5 = vpack.i.b16 %v478_v57, %v478_v57  ;;  %503 = vst [vmem:[%s1273_s21 + $0x1] sm:$0x1] %v502_v61  ;;  %506 = vst [vmem:[%s1273_s21 + $0x2] sm:$0x1] %v505_v62  ;;  %v508_v6 = vsel %vm1278_vm13, %v482_v58, %v507_v50  ;;  %v514_v7 = vsel %vm1278_vm13, %v484_v59, %v513_v54 }
 0x258   : > { %512 = vst [vmem:[%s1273_s21 + $0x4] sm:$0x1] %v511_v63  ;;  %v517_v8 = vsel %vm1278_vm13, %v969_v60, %v516_v55  ;;  %509 = vst [vmem:[%s1273_s21 + $0x3] sm:$0x1] %v508_v6 }
 0x259   : > { %515 = vst [vmem:[%s1273_s21 + $0x5] sm:$0x1] %v514_v7  ;;  %518 = vst [vmem:[%s1273_s21 + $0x6] sm:$0x1] %v517_v8  ;;  %v520_v9 = vsel %vm1278_vm13, %v486_v5, %v519_v2 }
 0x25a   : > { %521 = vst [vmem:[%s1273_s21 + $0x7] sm:$0x1] %v520_v9 }
 0x25c   : > { %v845_v37 = vld [vmem:[%s1273_s21] sm:$0x1] }
 0x25e   : > { %v848_v44 = vld [vmem:[%s1273_s21 + $0x1] sm:$0x1]  ;;  %v851_v45 = vld [vmem:[%s1273_s21 + $0x2] sm:$0x1] }
 0x25f   : > { %v857_v46 = vld [vmem:[%s1273_s21 + $0x4] sm:$0x1]  ;;  %v854_v49 = vld [vmem:[%s1273_s21 + $0x3] sm:$0x1] }
 0x260   : > { %v860_v51 = vld [vmem:[%s1273_s21 + $0x5] sm:$0x1]  ;;  %v863_v3 = vld [vmem:[%s1273_s21 + $0x6] sm:$0x1] }
 0x261   : > { %v866_v1 = vld [vmem:[%s1273_s21 + $0x7] sm:$0x1] }
 0x2de   : > { %v688_v10 = vpop.xlane.xlu0 %687 }
 0x2df   : > { %v689_v11 = vsub.f32 %v681_v43, %v688_v10 }
 0x2e1   : > { %v690_v12 = vpack.c.bf16 %v689_v11, %v689_v11 }
 0x2e3   : > { %v692_v13 = vmul.bf16 1069105081, %v690_v12 }
 0x2e5   : > { %1098 = vpow.bf16 %v692_v13 }
 0x2f3   : > { %v1099_v14 = vpop.eup %1098 }
 0x2f4   : > { %1032 = vmatmul.mubr.msk.bf16.vlgmr.msra.gmra.mxu0 %vm336_vm9, %v1099_v14  ;;  %v694_v15 = vunpack.c.l.bf16 %v1099_v14 }
 0x2f6   : > { %v695_v16 = vsel %vm336_vm9, %v694_v15, 0.0 }
 0x2f7   : > { %696 = vadd.xlane.f32.xlu1 %v695_v16 }
 0x380   : > { %v697_v17 = vpop.xlane.xlu1 %696 }
 0x381   : > { %1100 = vrcp.f32 %v697_v17 }
 0x38e   : > { %v1101_v18 = vpop.eup %1100 }
 0x3b4   : > { %v785_v19 = vpop.f32.mrf.mxu0 }
 0x3b5   : > { %v792_v20 = vmul.f32 %v1101_v18, %v785_v19 }
 0x3b6   : > { %v1033_v21 = vpop.f32.mrf.mxu0 }
 0x3b7   : > { %v793_v22 = vpack.c.bf16 %v792_v20, %v792_v20 }
 0x3b8   : > { %v788_v23 = vpop.f32.mrf.mxu0 }
 0x3b9   : > { %v801_v24 = vrot.slane %v793_v22, %v1266_v0 }
 0x3ba   : > { %v1034_v25 = vpop.f32.mrf.mxu0 }
 0x3bb   : > { %v802_v26 = vcombine.high %v801_v24, %v801_v24  ;;  %v809_v27 = vrot.slane %v801_v24, %v1266_v0 }
 0x3bd   : > { %v816_v28 = vrot.slane %v802_v26, %v1266_v0  ;;  %v817_v29 = vcombine.high %v809_v27, %v809_v27  ;;  %v820_v30 = vunpack.i.h.s16 %v809_v27  ;;  %v996_v31 = vpack.i.b16 %v809_v27, %v809_v27 }
 0x3bf   : > { %v818_v33 = vcombine.high %v816_v28, %v816_v28  ;;  %v822_v34 = vunpack.i.h.s16 %v816_v28  ;;  %v824_v35 = vunpack.i.h.s16 %v817_v29  ;;  %v828_v36 = vpack.i.b16 %v820_v30, %v820_v30 }
 0x3c0   : > { %v997_v0 = vpack.i.b16 %v816_v28, %v816_v28  ;;  %v998_v38 = vpack.i.b16 %v817_v29, %v817_v29  ;;  %v846_v39 = vsel %vm1322_vm15, %v996_v31, %v845_v37 }
 0x3c1   : > { %v826_v40 = vunpack.i.h.s16 %v818_v33  ;;  %v830_v41 = vpack.i.b16 %v822_v34, %v822_v34  ;;  %v832_v42 = vpack.i.b16 %v824_v35, %v824_v35  ;;  %v999_v43 = vpack.i.b16 %v818_v33, %v818_v33  ;;  %847 = vst [vmem:[%s1273_s21] sm:$0x1] %v846_v39 }
 0x3c2   : > { %v849_v47 = vsel %vm1322_vm15, %v828_v36, %v848_v44  ;;  %v852_v48 = vsel %vm1322_vm15, %v997_v0, %v851_v45  ;;  %v858_v50 = vsel %vm1322_vm15, %v998_v38, %v857_v46 }
 0x3c3   : > { %v834_v52 = vpack.i.b16 %v826_v40, %v826_v40  ;;  %850 = vst [vmem:[%s1273_s21 + $0x1] sm:$0x1] %v849_v47  ;;  %853 = vst [vmem:[%s1273_s21 + $0x2] sm:$0x1] %v852_v48  ;;  %v855_v53 = vsel %vm1322_vm15, %v830_v41, %v854_v49  ;;  %v861_v54 = vsel %vm1322_vm15, %v832_v42, %v860_v51 }
 0x3c4   : > { %859 = vst [vmem:[%s1273_s21 + $0x4] sm:$0x1] %v858_v50  ;;  %v864_v55 = vsel %vm1322_vm15, %v999_v43, %v863_v3  ;;  %856 = vst [vmem:[%s1273_s21 + $0x3] sm:$0x1] %v855_v53 }
 0x3c5   : > { %862 = vst [vmem:[%s1273_s21 + $0x5] sm:$0x1] %v861_v54  ;;  %865 = vst [vmem:[%s1273_s21 + $0x6] sm:$0x1] %v864_v55  ;;  %v867_v56 = vsel %vm1322_vm15, %v834_v52, %v866_v1 }
 0x3c6   : > { %868 = vst [vmem:[%s1273_s21 + $0x7] sm:$0x1] %v867_v56 }
 0x3c7 PF: > { %s12_s9 = sadd.s32 1, %s1108_s9  }
 0x3c8   : > { %p9_p4 = scmp.ge.s32.totalorder %s12_s9, 4  }
 0x3ca   :  { %11 = sbr.rel (!%p9_p4) target bundleno = 1 (0x1), region = 61 }

// kernel: regressor_forward.17
= control target key start
LH: loop header
LB: loop body
LE: loop exit
PB: predicated region body
PF: predicated region fallthrough
CT: control target
= control target key end

     0   :  { %s592_s21 = smov 0   ;;  %s650_s0 = inlined_call_operand.vmem [shape: bf16[16,128], index: 0, kind: input, shape index: {}]   ;;  %s651_s1 = inlined_call_operand.vmem [shape: bf16[128,32], index: 1, kind: input, shape index: {}]   ;;  %s652_s2 = inlined_call_operand.vmem [shape: bf16[1,32], index: 2, kind: input, shape index: {}]   ;;  %s653_s3 = inlined_call_operand.vmem [shape: bf16[16,32], index: 3, kind: input, shape index: {}]   ;;  %s654_s4 = inlined_call_operand.vmem [shape: f32[1,32], index: 4, kind: input, shape index: {}]   ;;  %s655_s5 = inlined_call_operand.vmem [shape: f32[1,32], index: 5, kind: input, shape index: {}]   ;;  %s656_s6 = inlined_call_operand.vmem [shape: bf16[16,32], index: 6, kind: output, shape index: {}]  }
   0x1 LB: > { %s478_s22 = sadd.s32 4294967295, %s553_s21   ;;  %p482_p0 = scmp.ge.s32.totalorder %s553_s21, 1  ;;  %s553_s21 = sphi %s592_s21, %s16_s21  }
   0x2   : > { %p220_p1 = scmp.lt.s32.totalorder %s553_s21, 3 }
   0x4   : > { %p221_p2 = pnand %p482_p0, %p220_p1 }
   0x5   : > { %p252_p3 = scmp.lt.s32.totalorder (!%p221_p2), %s478_s22, 1 }
   0x6   : > { %224 = sbr.rel (%p221_p2) target bundleno = 552 (0x228), region = 44 }
   0xb   : > { %v537_v0 = vld [vmem:[%s651_s1 + $0x38] sm:$0xff]   ;;  %v555_v1 = vmov 0.0   ;;  %v538_v2 = vld [vmem:[%s651_s1 + $0x30] sm:$0xff]   ;;  %vm556_vm0 = vmmov 0   ;;  %v539_v3 = vld [vmem:[%s651_s1 + $0x28] sm:$0xff]   ;;  %s658_s22 = smov (!%p252_p3, %s478_s22), 1  ;;  %v284_v10 = vlaneseq }
   0xc   : > { %507 = vmatprep.subr.bf16.mxu0 %v555_v1  ;;  %523 = vmatprep.mubr.msk.bf16.mxu0 %vm556_vm0, %v555_v1  ;;  %v540_v4 = vld [vmem:[%s651_s1 + $0x20] sm:$0xff]   ;;  %v541_v5 = vld [vmem:[%s651_s1 + $0x18] sm:$0xff]   ;;  %v542_v6 = vld [vmem:[%s651_s1 + $0x10] sm:$0xff]   ;;  %s621_s13 = sshll.u32 %s658_s22, 2  ;;  %vm379_vm1 = vcmask 261120   ;;  %vm411_vm2 = vcmask 257024  }
   0xd   : > { %508 = vmatpush3.bf16.msra.mxu0 %v537_v0  ;;  %v543_v7 = vld [vmem:[%s651_s1 + $0x8] sm:$0xff]   ;;  %v544_v8 = vld [vmem:[%s651_s1] sm:$0xff]   ;;  %s255_s18 = scalar_lea.vmem %s650_s0, %s621_s13  ;;  %v285_v11 = vshrl.u32 %v284_v10, 7  ;;  %s259_s24 = scalar_lea.vmem %s653_s3, %s621_s13 }
   0xe   : > { %509 = vmatprep.subr.bf16.mxu0 %v555_v1  ;;  %v265_v9 = vld [vmem:[%s255_s18] sm:$0xf]  ;;  %s263_s7 = scalar_lea.vmem %s656_s6, %s621_s13 }
   0xf   : > { %v282_v12 = vld [vmem:[%s652_s2] sm:$0x1]  ;;  %v286_v14 = vsub.s32 0, %v285_v11 }
  0x10   : > { %v283_v13 = vunpack.c.l.bf16 %v282_v12  ;;  %v376_v15 = vld [vmem:[%s259_s24] sm:$0xf] }
  0x11   : > { %510 = vmatpush3.bf16.msra.mxu0 %v538_v2  ;;  %v377_v17 = vunpack.c.l.bf16 %v376_v15  ;;  %v494_v34 = vld [vmem:[%s654_s4] ss:$0 sm:$0xff] }
  0x12   : > { %511 = vmatprep.subr.bf16.mxu0 %v555_v1  ;;  %v287_v16 = vrot.slane %v283_v13, %v286_v14  ;;  %v495_v36 = vld [vmem:[%s655_s5] ss:$0 sm:$0xff] }
  0x15   : > { %512 = vmatpush3.bf16.msra.mxu0 %v539_v3 }
  0x16   : > { %513 = vmatprep.subr.bf16.mxu0 %v555_v1 }
  0x19   : > { %514 = vmatpush3.bf16.msra.mxu0 %v540_v4 }
  0x1a   : > { %515 = vmatprep.subr.bf16.mxu0 %v555_v1 }
  0x1d   : > { %516 = vmatpush3.bf16.msra.mxu0 %v541_v5 }
  0x1e   : > { %517 = vmatprep.subr.bf16.mxu0 %v555_v1 }
  0x21   : > { %518 = vmatpush3.bf16.msra.mxu0 %v542_v6 }
  0x22   : > { %519 = vmatprep.subr.bf16.mxu0 %v555_v1 }
  0x25   : > { %520 = vmatpush3.bf16.msra.mxu0 %v543_v7 }
  0x26   : > { %521 = vmatprep.subr.bf16.mxu0 %v555_v1 }
  0x29   : > { %522 = vmatpush3.bf16.msra.mxu0 %v544_v8 }
  0x2c   : > { %524 = vmatmul.mubr.bf16.vlgmr.msra.gmra.mxu0 %v265_v9 }
  0xec   : > { %v370_v18 = vpop.f32.mrf.mxu0 }
  0xed   : > { %v371_v19 = vadd.f32 %v370_v18, %v287_v16 }
  0xee   : > { %v525_v20 = vpop.f32.mrf.mxu0 }
  0xef   : > { %v378_v21 = vadd.f32 %v377_v17, %v371_v19 }
  0xf0   : > { %v373_v22 = vpop.f32.mrf.mxu0 }
  0xf1   : > { %v380_v23 = vsel %vm379_vm1, %v378_v21, 0.0 }
  0xf2   : > { %381 = vadd.xlane.f32.xlu0 %v380_v23  ;;  %v526_v24 = vpop.f32.mrf.mxu0 }
 0x17b   : > { %v382_v25 = vpop.xlane.xlu0 %381 }
 0x17c   : > { %v384_v26 = vmul.f32 0.03125, %v382_v25 }
 0x17e   : > { %v385_v27 = vsub.f32 %v378_v21, %v384_v26 }
 0x180   : > { %v386_v28 = vmul.f32 %v385_v27, %v385_v27 }
 0x182   : > { %v387_v29 = vsel %vm379_vm1, %v386_v28, 0.0 }
 0x183   : > { %388 = vadd.xlane.f32.xlu0 %v387_v29 }
 0x20c   : > { %v389_v30 = vpop.xlane.xlu0 %388 }
 0x20d   : > { %v390_v31 = vmul.f32 0.03125, %v389_v30 }
 0x20f   : > { %v391_v32 = vadd.f32 1e-12, %v390_v31 }
 0x211   : > { %545 = vrsqrt.f32 %v391_v32 }
 0x21e   : > { %v546_v33 = vpop.eup %545 }
 0x21f   : > { %v393_v35 = vmul.f32 %v546_v33, %v385_v27 }
 0x221   : > { %v401_v37 = vmul.f32 %v494_v34, %v393_v35 }
 0x223   : > { %v409_v38 = vadd.f32 %v495_v36, %v401_v37 }
 0x225   : > { %v410_v39 = vpack.c.bf16 %v409_v38, %v409_v38 }
 0x227   : > { %412 = vst.msk [vmem:[%s263_s7] sm:$0xf] %vm411_vm2, %v410_v39 }
 0x228 PF: > { %s16_s21 = sadd.s32 1, %s553_s21  }
 0x229   : > { %p13_p4 = scmp.ge.s32.totalorder %s16_s21, 4  }
 0x22b   :  { %15 = sbr.rel (!%p13_p4) target bundleno = 1 (0x1), region = 77 }

// kernel: regressor_forward.16
= control target key start
LH: loop header
LB: loop body
LE: loop exit
PB: predicated region body
PF: predicated region fallthrough
CT: control target
= control target key end

     0   :  { %s496_s12 = smov 0   ;;  %s498_s13 = smov 0   ;;  %s541_s0 = inlined_call_operand.vmem [shape: bf16[16,32], index: 0, kind: input, shape index: {}]   ;;  %s542_s1 = inlined_call_operand.vmem [shape: bf16[32,128], index: 1, kind: input, shape index: {}]   ;;  %s543_s2 = inlined_call_operand.vmem [shape: bf16[1,128], index: 2, kind: input, shape index: {}]   ;;  %s544_s3 = inlined_call_operand.vmem [shape: bf16[16,128], index: 3, kind: output, shape index: {}]  }
   0x1   :  { %s500_s14 = smov 0  }
   0x2 LB: > { %s25_s15 = sadd.s32 1, %s468_s13  ;;  %p401_p0 = scmp.ge.s32.totalorder %s472_s14, 1  ;;  %s472_s14 = sphi %s500_s14, %s13_s14   ;;  %s468_s13 = sphi %s498_s13, %s546_s13   ;;  %s464_s12 = sphi %s496_s12, %s545_s12  }
   0x3   : > { %p27_p1 = scmp.ge.s32.totalorder %s25_s15, 2  ;;  %p167_p2 = scmp.lt.s32.totalorder %s472_s14, 3 }
   0x5   : > { %s548_s15 = smov (%p27_p1, %s25_s15), 0  ;;  %p168_p3 = pnand %p401_p0, %p167_p2 }
   0x6   : > { %p199_p4 = scmp.lt.s32.totalorder (!%p168_p3), %s464_s12, 1 }
   0x7   : > { %171 = sbr.rel (%p168_p3) target bundleno = 247 (0xf7), region = 32 }
   0xc   : > { %v446_v0 = vld [vmem:[%s542_s1 + $0x8] sm:$0xff]   ;;  %v474_v1 = vmov 0.0   ;;  %v447_v2 = vld [vmem:[%s542_s1] sm:$0xff]   ;;  %vm475_vm0 = vmmov 0   ;;  %s550_s12 = smov (!%p199_p4, %s464_s12), 1  ;;  %vm241_vm1 = vcmask 261120   ;;  %v225_v4 = vlaneseq }
   0xd   : > { %412 = vmatprep.subr.bf16.mxu0 %v474_v1  ;;  %416 = vmatprep.mubr.msk.bf16.mxu0 %vm475_vm0, %v474_v1  ;;  %s402_s20 = sshll.u32 %s550_s12, 2  ;;  %v223_v6 = vld [vmem:[%s543_s2] sm:$0x1] }
   0xe   : > { %413 = vmatpush3.bf16.msra.mxu0 %v446_v0  ;;  %s202_s23 = scalar_lea.vmem %s541_s0, %s402_s20  ;;  %v226_v5 = vshrl.u32 %v225_v4, 7  ;;  %v224_v7 = vunpack.c.l.bf16 %v223_v6  ;;  %s216_s28 = scalar_lea.vmem %s544_s3, %s402_s20 }
   0xf   : > { %414 = vmatprep.subr.bf16.mxu0 %v474_v1  ;;  %v218_v3 = vld [vmem:[%s202_s23] sm:$0xf] }
  0x10   : > { %v227_v8 = vsub.s32 0, %v226_v5 }
  0x12   : > { %415 = vmatpush3.bf16.msra.mxu0 %v447_v2  ;;  %v228_v9 = vrot.slane %v224_v7, %v227_v8 }
  0x15   : > { %417 = vmatmul.mubr.msk.bf16.vlgmr.msra.gmra.mxu0 %vm241_vm1, %v218_v3 }
  0xd5   : > { %v279_v10 = vpop.f32.mrf.mxu0 }
  0xd6   : > { %v280_v11 = vadd.f32 %v279_v10, %v228_v9 }
  0xd7   : > { %v418_v12 = vpop.f32.mrf.mxu0 }
  0xd8   : > { %v286_v13 = vmul.f32 %v280_v11, %v280_v11  ;;  %v285_v21 = vmul.f32 0.5, %v280_v11 }
  0xd9   : > { %v282_v14 = vpop.f32.mrf.mxu0 }
  0xda   : > { %v287_v15 = vmul.f32 %v286_v13, %v280_v11 }
  0xdb   : > { %v419_v16 = vpop.f32.mrf.mxu0 }
  0xdc   : > { %v288_v17 = vmul.f32 0.044715, %v287_v15 }
  0xde   : > { %v289_v18 = vadd.f32 %v288_v17, %v280_v11 }
  0xe0   : > { %v290_v19 = vmul.f32 0.7978846, %v289_v18 }
  0xe2   : > { %448 = vtanh.f32 %v290_v19 }
  0xef   : > { %v449_v20 = vpop.eup %448 }
  0xf0   : > { %v292_v22 = vadd.f32 1.0, %v449_v20 }
  0xf2   : > { %v293_v23 = vmul.f32 %v292_v22, %v285_v21 }
  0xf4   : > { %v294_v24 = vpack.c.bf16 %v293_v23, %v293_v23 }
  0xf6   : > { %295 = vst [vmem:[%s216_s28] sm:$0xf] %v294_v24 }
  0xf7 PF: > { %s13_s14 = sadd.s32 1, %s472_s14   ;;  %s545_s12 = smov %s468_s13 }
  0xf8   : > { %p10_p5 = scmp.ge.s32.totalorder %s13_s14, 4   ;;  %s546_s13 = smov %s548_s15 }
  0xfa   :  { %12 = sbr.rel (!%p10_p5) target bundleno = 2 (0x2), region = 68 }

// kernel: regressor_forward.23
= control target key start
LH: loop header
LB: loop body
LE: loop exit
PB: predicated region body
PF: predicated region fallthrough
CT: control target
= control target key end

     0   :  { %v200_v0 = vmov 0.0   ;;  %vm201_vm0 = vmmov 0   ;;  %vm46_vm1 = vcmask 261120   ;;  %v30_v7 = vlaneseq  ;;  %s258_s1 = inlined_call_operand.vmem [shape: bf16[32,32], index: 1, kind: input, shape index: {}]   ;;  %s259_s0 = inlined_call_operand.vmem [shape: bf16[2,32], index: 0, kind: input, shape index: {}]   ;;  %s260_s3 = inlined_call_operand.vmem [shape: bf16[32,1], index: 3, kind: input, shape index: {}]   ;;  %s261_s4 = inlined_call_operand.<no memory space> [shape: bf16[1,1], index: 4, kind: input, shape index: {}]   ;;  %s262_s2 = inlined_call_operand.vmem [shape: bf16[1,32], index: 2, kind: input, shape index: {}]   ;;  %s263_s5 = inlined_call_operand.vmem [shape: f32[2,1], index: 5, kind: output, shape index: {}]  }
   0x1   :  { %176 = vmatprep.subr.bf16.mxu0 %v200_v0  ;;  %v194_v1 = vld [vmem:[%s258_s1 + $0x8] sm:$0xff]   ;;  %180 = vmatprep.mubr.msk.bf16.mxu0 %vm201_vm0, %v200_v0  ;;  %v195_v2 = vld [vmem:[%s258_s1] sm:$0xff]   ;;  %v10_v6 = vstv %s261_s4  ;;  %vm158_vm2 = vcmask 1024  }
   0x2   :  { %184 = vmatprep.subr.bf16.mxu1 %v200_v0  ;;  %188 = vmatprep.mubr.msk.bf16.mxu1 %vm201_vm0, %v200_v0  ;;  %v23_v3 = vld [vmem:[%s259_s0] sm:$0x1]  ;;  %v196_v4 = vld [vmem:[%s260_s3 + $0x8] sm:$0xff]   ;;  %11 = vst [vmem:[#allocation2] sm:$0x1] %v10_v6  ;;  %v31_v8 = vshrl.u32 %v30_v7, 7 }
   0x3   :  { %177 = vmatpush3.bf16.msra.mxu0 %v194_v1  ;;  %185 = vmatpush3.bf16.msra.mxu1 %v196_v4  ;;  %v197_v5 = vld [vmem:[%s260_s3] sm:$0xff]  }
   0x4   :  { %178 = vmatprep.subr.bf16.mxu0 %v200_v0  ;;  %186 = vmatprep.subr.bf16.mxu1 %v200_v0  ;;  %v28_v9 = vld [vmem:[%s262_s2] sm:$0x1]  ;;  %v32_v11 = vsub.s32 0, %v31_v8 }
   0x5   :  { %v29_v10 = vunpack.c.l.bf16 %v28_v9 }
   0x7   :  { %179 = vmatpush3.bf16.msra.mxu0 %v195_v2  ;;  %187 = vmatpush3.bf16.msra.mxu1 %v197_v5  ;;  %v33_v12 = vrot.slane %v29_v10, %v32_v11 }
   0x9   :  { %v96_v20 = vld [vmem:[#allocation2] sm:$0x1] }
   0xa   :  { %181 = vmatmul.mubr.msk.bf16.vlgmr.msra.gmra.mxu0 %vm46_vm1, %v23_v3  ;;  %v97_v21 = vunpack.c.l.bf16 %v96_v20 }
   0xc   :  { %v101_v22 = vrot.slane %v97_v21, %v32_v11 }
  0xca   :  { %v84_v13 = vpop.f32.mrf.mxu0 }
  0xcb   :  { %v85_v14 = vadd.f32 %v84_v13, %v33_v12 }
  0xcc   :  { %v182_v15 = vpop.f32.mrf.mxu0 }
  0xcd   :  { %198 = vtanh.f32 %v85_v14 }
  0xce   :  { %v87_v16 = vpop.f32.mrf.mxu0 }
  0xd0   :  { %v183_v17 = vpop.f32.mrf.mxu0 }
  0xda   :  { %v199_v18 = vpop.eup %198 }
  0xdb   :  { %v91_v19 = vpack.c.bf16 %v199_v18, %v199_v18 }
  0xdd   :  { %189 = vmatmul.mubr.msk.bf16.vlgmr.msra.gmra.mxu1 %vm46_vm1, %v91_v19 }
 0x19d   :  { %v151_v23 = vpop.f32.mrf.mxu1 }
 0x19e   :  { %v152_v24 = vadd.f32 %v151_v23, %v101_v22 }
 0x19f   :  { %v190_v25 = vpop.f32.mrf.mxu1 }
 0x1a0   :  { %v157_v26 = vmax.f32 %v152_v24, 0.0 }
 0x1a1   :  { %v154_v27 = vpop.f32.mrf.mxu1 }
 0x1a2   :  { %159 = vst.msk [vmem:[%s263_s5] sm:$0x3] %vm158_vm2, %v157_v26 }
 0x1a3   :  { %v191_v28 = vpop.f32.mrf.mxu1 }

</bundles_post_ra>
